<compile_context>
chip_gen: v5e
topology: v5e:2x2
jax: 0.10.0
libtpu: 0.0.40
codegen_flags: <defaults>
</compile_context>

<pallas_src>
import math
from functools import partial

import jax
import jax.numpy as jnp
from jax import lax
from jax.experimental import pallas as pl
from jax.experimental.pallas import tpu as pltpu


# ----------------------------------------------------------------------------
# Positional embedding table (matches PositionalEmbedding.make_embedding)
# ----------------------------------------------------------------------------
def make_positional_embedding(dim: int, max_length: int = 10000) -> jnp.ndarray:
    position = jnp.arange(0, max_length, dtype=jnp.float32)[:, None]          # (L, 1)
    div_term = jnp.exp(
        jnp.arange(0, dim, 2, dtype=jnp.float32)
        * (-math.log(max_length / 2 / math.pi) / dim)
    )                                                                          # (dim/2,)
    sin_part = jnp.sin(position * div_term)                                    # (L, dim/2)
    cos_part = jnp.cos(position * div_term)                                    # (L, dim/2)
    emb = jnp.zeros((max_length, dim), dtype=jnp.float32)
    emb = emb.at[:, 0::2].set(sin_part)
    emb = emb.at[:, 1::2].set(cos_part)
    return emb


# ----------------------------------------------------------------------------
# Pallas kernel: FFN forward for one batch tile, looping over 256-lane slabs.
# Batch lives on the lane axis: activations are (features, lanes) and every
# matmul is W @ h^T with a wide moving operand on the MXU.
# ----------------------------------------------------------------------------
def ffn_kernel(
    xT_ref, tembT_ref,
    w_in_ref, b_in_ref,
    w_hid_ref, b_hid_ref,
    w_out_ref, b_out_ref,
    o_ref,
    *, slab, matmul_dtype,
):
    n_hidden = w_hid_ref.shape[0]
    n_slabs = xT_ref.shape[-1] // slab

    def one_slab(s, carry):
        c0 = pl.multiple_of(s * slab, slab)            # aligned lane offset
        x_s = xT_ref[:, pl.ds(c0, slab)]               # (in, slab)  bf16
        t_s = tembT_ref[:, pl.ds(c0, slab)]            # (E, slab)   bf16

        # init_embed: h^T = W_in @ x^T + b_in ; then add the time embedding.
        h = jnp.dot(w_in_ref[...], x_s, preferred_element_type=jnp.float32)
        h = h + b_in_ref[...] + t_s                    # f32 adds, lane-dense

        # hidden stack: 5 x (Linear + ReLU), statically unrolled.
        for layer in range(n_hidden):
            h = jnp.dot(w_hid_ref[layer], h.astype(matmul_dtype),
                        preferred_element_type=jnp.float32)
            h = jnp.maximum(h + b_hid_ref[layer], 0.0)

        # output projection (no activation), lane-dense store.
        out = jnp.dot(w_out_ref[...], h.astype(matmul_dtype),
                      preferred_element_type=jnp.float32) + b_out_ref[...]
        o_ref[:, pl.ds(c0, slab)] = out.astype(o_ref.dtype)
        return carry

    # Rolled loop: bounds the live activation to one (E, slab) block.
    lax.fori_loop(0, n_slabs, one_slab, 0)


def _round_up(v: int, m: int) -> int:
    return ((v + m - 1) // m) * m


# ----------------------------------------------------------------------------
# Wrapper
# ----------------------------------------------------------------------------
def ffn_forward(x, t, params, pos_table, *, block_b: int = 1024, slab: int = 256,
                matmul_dtype=jnp.bfloat16):
    """x: (B, in_dim) f32, t: (B,) int32 -> (B, in_dim) f32."""
    B, in_dim = x.shape
    embed_dim = params["w_in"].shape[0]
    n_hidden = params["w_hid"].shape[0]

    # ---- batch tiling: lane axis, 256-multiples, >=2 tiles when possible ----
    LANE = 256                                       # MXU pass width (v6e/v7x)
    block_b = max(LANE, _round_up(block_b, LANE))
    if B > LANE:                                     # give v7x's 2nd core work
        block_b = min(block_b, _round_up(pl.cdiv(B, 2), LANE))
    block_b = min(block_b, _round_up(B, LANE))       # don't exceed padded batch
    n_tiles = pl.cdiv(B, block_b)
    Bp = n_tiles * block_b

    slab = min(slab, block_b)
    assert block_b % slab == 0, "slab must divide block_b"

    # ---- JAX-side glue (single gather + cast; everything else is tiny) ------
    # temb dominates the input bytes -> ship it (and x) in bf16.
    tembT = jnp.pad(pos_table[t].astype(matmul_dtype).T, ((0, 0), (0, Bp - B)))
    xT = jnp.pad(x.astype(matmul_dtype).T, ((0, 0), (0, Bp - B)))

    # Weights are (out_features, in_features) => LHS of the transposed matmuls.
    w_in = params["w_in"].astype(matmul_dtype)            # (E, in)
    w_hid = params["w_hid"].astype(matmul_dtype)          # (5, E, E)
    w_out = params["w_out"].astype(matmul_dtype)          # (in, E)
    b_in = params["b_in"].reshape(embed_dim, 1)           # column vectors ->
    b_hid = params["b_hid"].reshape(n_hidden, embed_dim, 1)   # broadcast over lanes
    b_out = params["b_out"].reshape(in_dim, 1)

    kernel = partial(ffn_kernel, slab=slab, matmul_dtype=matmul_dtype)
    args = (xT, tembT, w_in, b_in, w_hid, b_hid, w_out, b_out)

    def build(single_buffer_weights: bool):
        def tiled(rows):   # batch-tiled activation/output spec (lane-dense)
            return pl.BlockSpec((rows, block_b), lambda i: (0, i))

        def full(shape):   # small weight: whole array resident every step
            if single_buffer_weights:
                # Block index never changes -> one VMEM copy is enough.
                return pl.BlockSpec(shape, lambda i: (0,) * len(shape),
                                    pipeline_mode=pl.Buffered(1))
            return pl.BlockSpec(shape, lambda i: (0,) * len(shape))

        return pl.pallas_call(
            kernel,
            out_shape=jax.ShapeDtypeStruct((in_dim, Bp), jnp.float32),
            grid=(n_tiles,),
            in_specs=[
                tiled(in_dim), tiled(embed_dim),
                full(w_in.shape), full(b_in.shape),
                full(w_hid.shape), full(b_hid.shape),
                full(w_out.shape), full(b_out.shape),
            ],
            out_specs=tiled(in_dim),
            compiler_params=pltpu.CompilerParams(
                dimension_semantics=("parallel",),   # megacore sharding on v7x
            ),
        )

    try:
        outT = build(True)(*args)
    except Exception:
        # Fallback for jax versions without BlockSpec pipeline_mode support.
        outT = build(False)(*args)

    return outT[:, :B].T                                   # (B, in_dim)


# ----------------------------------------------------------------------------
# Deterministic parameter init (PyTorch nn.Linear layout: W is (out, in))
# ----------------------------------------------------------------------------
def init_params(key, in_dim: int, embed_dim: int, num_hidden: int = 5):
    def linear(key, fan_in, fan_out):
        kw, kb = jax.random.split(key)
        bound = 1.0 / math.sqrt(fan_in)
        w = jax.random.uniform(kw, (fan_out, fan_in), jnp.float32, -bound, bound)
        b = jax.random.uniform(kb, (fan_out,), jnp.float32, -bound, bound)
        return w, b

    keys = jax.random.split(key, num_hidden + 2)
    w_in, b_in = linear(keys[0], in_dim, embed_dim)
    w_hid, b_hid = [], []
    for i in range(num_hidden):
        w, b = linear(keys[1 + i], embed_dim, embed_dim)
        w_hid.append(w)
        b_hid.append(b)
    w_out, b_out = linear(keys[num_hidden + 1], embed_dim, in_dim)
    return {
        "w_in": w_in, "b_in": b_in,
        "w_hid": jnp.stack(w_hid), "b_hid": jnp.stack(b_hid),
        "w_out": w_out, "b_out": b_out,
    }


# ----------------------------------------------------------------------------
# Pure-JAX reference (PyTorch semantics: y = x @ W.T + b).  matmul_dtype /
# temb_dtype let us build a mixed-precision twin of the kernel for a tight
# verification in addition to the loose f32 check.
# ----------------------------------------------------------------------------
def ffn_reference(x, t, params, pos_table, *, matmul_dtype=jnp.float32,
                  temb_dtype=jnp.float32):
    def mm(a, w):
        return jnp.dot(a.astype(matmul_dtype), w.astype(matmul_dtype).T,
                       preferred_element_type=jnp.float32)

    temb = pos_table[t].astype(temb_dtype).astype(jnp.float32)
    h = mm(x, params["w_in"]) + params["b_in"]
    h = h + temb
    for i in range(params["w_hid"].shape[0]):
        h = jnp.maximum(mm(h, params["w_hid"][i]) + params["b_hid"][i], 0.0)
    return mm(h, params["w_out"]) + params["b_out"]


if __name__ == "__main__":
    in_dim = 4
    embed_dim = 32
    batch = 777           # non-multiple of 256 -> exercises padding, 2 tiles x 2 slabs
    max_length = 10000

    key = jax.random.PRNGKey(0)
    k_params, k_x, k_t = jax.random.split(key, 3)

    params = init_params(k_params, in_dim, embed_dim)
    pos_table = make_positional_embedding(embed_dim, max_length)

    x = jax.random.normal(k_x, (batch, in_dim), dtype=jnp.float32)
    t = jax.random.randint(k_t, (batch,), 0, max_length, dtype=jnp.int32)

    out = ffn_forward(x, t, params, pos_table)
    out = jax.block_until_ready(out)
    assert out.shape == (batch, in_dim)

    # Tight check against a reference that applies the same bf16 operand /
    # bf16 time-embedding rounding the kernel uses.
    ref_mixed = ffn_reference(x, t, params, pos_table,
                              matmul_dtype=jnp.bfloat16, temb_dtype=jnp.bfloat16)
    assert jnp.allclose(out, ref_mixed, atol=2e-3, rtol=2e-3), \
        "mismatch vs bf16-operand reference"

    # Loose semantic check against the full-f32 PyTorch-equivalent reference.
    ref_f32 = ffn_reference(x, t, params, pos_table)
    assert jnp.allclose(out, ref_f32, atol=1e-1, rtol=1e-1), \
        "mismatch vs f32 reference"

    print("KERNEL_OK")
</pallas_src>

<mosaic_0001>
module attributes {stable_mosaic.version = 11 : i64} {
  func.func @ffn_kernel(%arg0: i32, %arg1: memref<4x512xbf16, #tpu.memory_space<vmem>>, %arg2: memref<32x512xbf16, #tpu.memory_space<vmem>>, %arg3: memref<32x4xbf16, #tpu.memory_space<vmem>>, %arg4: memref<32x1xf32, #tpu.memory_space<vmem>>, %arg5: memref<5x32x32xbf16, #tpu.memory_space<vmem>>, %arg6: memref<5x32x1xf32, #tpu.memory_space<vmem>>, %arg7: memref<4x32xbf16, #tpu.memory_space<vmem>>, %arg8: memref<4x1xf32, #tpu.memory_space<vmem>>, %arg9: memref<4x512xf32, #tpu.memory_space<vmem>>) attributes {dimension_semantics = [#tpu.dimension_semantics<parallel>], iteration_bounds = array<i64: 2>, scalar_prefetch = 0 : i64, scratch_operands = 0 : i64, tpu.core_type = #tpu.core_type<tc>, window_params = [{transform_indices = @transform_0, window_bounds = array<i64: 4, 512>}, {transform_indices = @transform_1, window_bounds = array<i64: 32, 512>}, {pipeline_mode = #tpu.pipeline_mode<synchronous>, transform_indices = @transform_2, window_bounds = array<i64: 32, 4>}, {pipeline_mode = #tpu.pipeline_mode<synchronous>, transform_indices = @transform_3, window_bounds = array<i64: 32, 1>}, {pipeline_mode = #tpu.pipeline_mode<synchronous>, transform_indices = @transform_4, window_bounds = array<i64: 5, 32, 32>}, {pipeline_mode = #tpu.pipeline_mode<synchronous>, transform_indices = @transform_5, window_bounds = array<i64: 5, 32, 1>}, {pipeline_mode = #tpu.pipeline_mode<synchronous>, transform_indices = @transform_6, window_bounds = array<i64: 4, 32>}, {pipeline_mode = #tpu.pipeline_mode<synchronous>, transform_indices = @transform_7, window_bounds = array<i64: 4, 1>}, {transform_indices = @transform_8, window_bounds = array<i64: 4, 512>}]} {
    %c0_i32 = arith.constant 0 : i32
    %c2_i32 = arith.constant 2 : i32
    %0 = arith.addi %c0_i32, %c2_i32 : i32
    %c1_i32 = arith.constant 1 : i32
    scf.for %arg10 = %c0_i32 to %0 step %c1_i32  : i32 {
      %c256_i32 = arith.constant 256 : i32
      %1 = arith.muli %arg10, %c256_i32 : i32
      %2 = tpu.assume_multiple %1, 256 : i32
      %c0 = arith.constant 0 : index
      %3 = arith.index_cast %2 : i32 to index
      %4 = vector.load %arg1[%c0, %3] : memref<4x512xbf16, #tpu.memory_space<vmem>>, vector<4x256xbf16>
      %c0_1 = arith.constant 0 : index
      %5 = arith.index_cast %2 : i32 to index
      %6 = vector.load %arg2[%c0_1, %5] : memref<32x512xbf16, #tpu.memory_space<vmem>>, vector<32x256xbf16>
      %c0_2 = arith.constant 0 : index
      %c0_3 = arith.constant 0 : index
      %7 = vector.load %arg3[%c0_2, %c0_3] : memref<32x4xbf16, #tpu.memory_space<vmem>>, vector<32x4xbf16>
      %cst = arith.constant dense<0.000000e+00> : vector<32x256xf32>
      %8 = tpu.matmul %7, %4, %cst {dimension_numbers = #tpu.dot_dimension_numbers<[1], [0], [0], [1], [0, 0, 1, 1], [], []>} : vector<32x4xbf16>, vector<4x256xbf16>, vector<32x256xf32> -> vector<32x256xf32>
      %c0_4 = arith.constant 0 : index
      %c0_5 = arith.constant 0 : index
      %9 = vector.load %arg4[%c0_4, %c0_5] : memref<32x1xf32, #tpu.memory_space<vmem>>, vector<32x1xf32>
      %10 = vector.broadcast %9 : vector<32x1xf32> to vector<32x256xf32>
      %11 = arith.addf %8, %10 : vector<32x256xf32>
      %12 = arith.extf %6 : vector<32x256xbf16> to vector<32x256xf32>
      %13 = arith.addf %11, %12 : vector<32x256xf32>
      %c0_6 = arith.constant 0 : index
      %c0_7 = arith.constant 0 : index
      %c0_8 = arith.constant 0 : index
      %14 = vector.load %arg5[%c0_6, %c0_7, %c0_8] : memref<5x32x32xbf16, #tpu.memory_space<vmem>>, vector<1x32x32xbf16>
      %15 = vector.shape_cast %14 : vector<1x32x32xbf16> to vector<32x32xbf16>
      %16 = arith.truncf %13 : vector<32x256xf32> to vector<32x256xbf16>
      %cst_9 = arith.constant dense<0.000000e+00> : vector<32x256xf32>
      %17 = tpu.matmul %15, %16, %cst_9 {dimension_numbers = #tpu.dot_dimension_numbers<[1], [0], [0], [1], [0, 0, 1, 1], [], []>} : vector<32x32xbf16>, vector<32x256xbf16>, vector<32x256xf32> -> vector<32x256xf32>
      %c0_10 = arith.constant 0 : index
      %c0_11 = arith.constant 0 : index
      %c0_12 = arith.constant 0 : index
      %18 = vector.load %arg6[%c0_10, %c0_11, %c0_12] : memref<5x32x1xf32, #tpu.memory_space<vmem>>, vector<1x32x1xf32>
      %19 = vector.shape_cast %18 : vector<1x32x1xf32> to vector<32x1xf32>
      %20 = vector.broadcast %19 : vector<32x1xf32> to vector<32x256xf32>
      %21 = arith.addf %17, %20 : vector<32x256xf32>
      %cst_13 = arith.constant 0.000000e+00 : f32
      %22 = vector.broadcast %cst_13 : f32 to vector<32x256xf32>
      %23 = arith.maximumf %21, %22 : vector<32x256xf32>
      %c1 = arith.constant 1 : index
      %c0_14 = arith.constant 0 : index
      %c0_15 = arith.constant 0 : index
      %24 = vector.load %arg5[%c1, %c0_14, %c0_15] : memref<5x32x32xbf16, #tpu.memory_space<vmem>>, vector<1x32x32xbf16>
      %25 = vector.shape_cast %24 : vector<1x32x32xbf16> to vector<32x32xbf16>
      %26 = arith.truncf %23 : vector<32x256xf32> to vector<32x256xbf16>
      %cst_16 = arith.constant dense<0.000000e+00> : vector<32x256xf32>
      %27 = tpu.matmul %25, %26, %cst_16 {dimension_numbers = #tpu.dot_dimension_numbers<[1], [0], [0], [1], [0, 0, 1, 1], [], []>} : vector<32x32xbf16>, vector<32x256xbf16>, vector<32x256xf32> -> vector<32x256xf32>
      %c1_17 = arith.constant 1 : index
      %c0_18 = arith.constant 0 : index
      %c0_19 = arith.constant 0 : index
      %28 = vector.load %arg6[%c1_17, %c0_18, %c0_19] : memref<5x32x1xf32, #tpu.memory_space<vmem>>, vector<1x32x1xf32>
      %29 = vector.shape_cast %28 : vector<1x32x1xf32> to vector<32x1xf32>
      %30 = vector.broadcast %29 : vector<32x1xf32> to vector<32x256xf32>
      %31 = arith.addf %27, %30 : vector<32x256xf32>
      %cst_20 = arith.constant 0.000000e+00 : f32
      %32 = vector.broadcast %cst_20 : f32 to vector<32x256xf32>
      %33 = arith.maximumf %31, %32 : vector<32x256xf32>
      %c2 = arith.constant 2 : index
      %c0_21 = arith.constant 0 : index
      %c0_22 = arith.constant 0 : index
      %34 = vector.load %arg5[%c2, %c0_21, %c0_22] : memref<5x32x32xbf16, #tpu.memory_space<vmem>>, vector<1x32x32xbf16>
      %35 = vector.shape_cast %34 : vector<1x32x32xbf16> to vector<32x32xbf16>
      %36 = arith.truncf %33 : vector<32x256xf32> to vector<32x256xbf16>
      %cst_23 = arith.constant dense<0.000000e+00> : vector<32x256xf32>
      %37 = tpu.matmul %35, %36, %cst_23 {dimension_numbers = #tpu.dot_dimension_numbers<[1], [0], [0], [1], [0, 0, 1, 1], [], []>} : vector<32x32xbf16>, vector<32x256xbf16>, vector<32x256xf32> -> vector<32x256xf32>
      %c2_24 = arith.constant 2 : index
      %c0_25 = arith.constant 0 : index
      %c0_26 = arith.constant 0 : index
      %38 = vector.load %arg6[%c2_24, %c0_25, %c0_26] : memref<5x32x1xf32, #tpu.memory_space<vmem>>, vector<1x32x1xf32>
      %39 = vector.shape_cast %38 : vector<1x32x1xf32> to vector<32x1xf32>
      %40 = vector.broadcast %39 : vector<32x1xf32> to vector<32x256xf32>
      %41 = arith.addf %37, %40 : vector<32x256xf32>
      %cst_27 = arith.constant 0.000000e+00 : f32
      %42 = vector.broadcast %cst_27 : f32 to vector<32x256xf32>
      %43 = arith.maximumf %41, %42 : vector<32x256xf32>
      %c3 = arith.constant 3 : index
      %c0_28 = arith.constant 0 : index
      %c0_29 = arith.constant 0 : index
      %44 = vector.load %arg5[%c3, %c0_28, %c0_29] : memref<5x32x32xbf16, #tpu.memory_space<vmem>>, vector<1x32x32xbf16>
      %45 = vector.shape_cast %44 : vector<1x32x32xbf16> to vector<32x32xbf16>
      %46 = arith.truncf %43 : vector<32x256xf32> to vector<32x256xbf16>
      %cst_30 = arith.constant dense<0.000000e+00> : vector<32x256xf32>
      %47 = tpu.matmul %45, %46, %cst_30 {dimension_numbers = #tpu.dot_dimension_numbers<[1], [0], [0], [1], [0, 0, 1, 1], [], []>} : vector<32x32xbf16>, vector<32x256xbf16>, vector<32x256xf32> -> vector<32x256xf32>
      %c3_31 = arith.constant 3 : index
      %c0_32 = arith.constant 0 : index
      %c0_33 = arith.constant 0 : index
      %48 = vector.load %arg6[%c3_31, %c0_32, %c0_33] : memref<5x32x1xf32, #tpu.memory_space<vmem>>, vector<1x32x1xf32>
      %49 = vector.shape_cast %48 : vector<1x32x1xf32> to vector<32x1xf32>
      %50 = vector.broadcast %49 : vector<32x1xf32> to vector<32x256xf32>
      %51 = arith.addf %47, %50 : vector<32x256xf32>
      %cst_34 = arith.constant 0.000000e+00 : f32
      %52 = vector.broadcast %cst_34 : f32 to vector<32x256xf32>
      %53 = arith.maximumf %51, %52 : vector<32x256xf32>
      %c4 = arith.constant 4 : index
      %c0_35 = arith.constant 0 : index
      %c0_36 = arith.constant 0 : index
      %54 = vector.load %arg5[%c4, %c0_35, %c0_36] : memref<5x32x32xbf16, #tpu.memory_space<vmem>>, vector<1x32x32xbf16>
      %55 = vector.shape_cast %54 : vector<1x32x32xbf16> to vector<32x32xbf16>
      %56 = arith.truncf %53 : vector<32x256xf32> to vector<32x256xbf16>
      %cst_37 = arith.constant dense<0.000000e+00> : vector<32x256xf32>
      %57 = tpu.matmul %55, %56, %cst_37 {dimension_numbers = #tpu.dot_dimension_numbers<[1], [0], [0], [1], [0, 0, 1, 1], [], []>} : vector<32x32xbf16>, vector<32x256xbf16>, vector<32x256xf32> -> vector<32x256xf32>
      %c4_38 = arith.constant 4 : index
      %c0_39 = arith.constant 0 : index
      %c0_40 = arith.constant 0 : index
      %58 = vector.load %arg6[%c4_38, %c0_39, %c0_40] : memref<5x32x1xf32, #tpu.memory_space<vmem>>, vector<1x32x1xf32>
      %59 = vector.shape_cast %58 : vector<1x32x1xf32> to vector<32x1xf32>
      %60 = vector.broadcast %59 : vector<32x1xf32> to vector<32x256xf32>
      %61 = arith.addf %57, %60 : vector<32x256xf32>
      %cst_41 = arith.constant 0.000000e+00 : f32
      %62 = vector.broadcast %cst_41 : f32 to vector<32x256xf32>
      %63 = arith.maximumf %61, %62 : vector<32x256xf32>
      %c0_42 = arith.constant 0 : index
      %c0_43 = arith.constant 0 : index
      %64 = vector.load %arg7[%c0_42, %c0_43] : memref<4x32xbf16, #tpu.memory_space<vmem>>, vector<4x32xbf16>
      %65 = arith.truncf %63 : vector<32x256xf32> to vector<32x256xbf16>
      %cst_44 = arith.constant dense<0.000000e+00> : vector<4x256xf32>
      %66 = tpu.matmul %64, %65, %cst_44 {dimension_numbers = #tpu.dot_dimension_numbers<[1], [0], [0], [1], [0, 0, 1, 1], [], []>} : vector<4x32xbf16>, vector<32x256xbf16>, vector<4x256xf32> -> vector<4x256xf32>
      %c0_45 = arith.constant 0 : index
      %c0_46 = arith.constant 0 : index
      %67 = vector.load %arg8[%c0_45, %c0_46] : memref<4x1xf32, #tpu.memory_space<vmem>>, vector<4x1xf32>
      %68 = vector.broadcast %67 : vector<4x1xf32> to vector<4x256xf32>
      %69 = arith.addf %66, %68 : vector<4x256xf32>
      %c0_47 = arith.constant 0 : index
      %70 = arith.index_cast %2 : i32 to index
      %71 = vector.load %arg9[%c0_47, %70] : memref<4x512xf32, #tpu.memory_space<vmem>>, vector<4x256xf32>
      tpu.vector_store %arg9[%c0_47, %70], %69 {strides = array<i32>} : memref<4x512xf32, #tpu.memory_space<vmem>>, vector<4x256xf32>,
    }
    %c2_i32_0 = arith.constant 2 : i32
    return
  }
  func.func @transform_0(%arg0: i32) -> (i32, i32) {
    %c0_i32 = arith.constant 0 : i32
    %c0_i32_0 = arith.constant 0 : i32
    return %c0_i32, %arg0 : i32, i32
  }
  func.func @transform_1(%arg0: i32) -> (i32, i32) {
    %c0_i32 = arith.constant 0 : i32
    %c0_i32_0 = arith.constant 0 : i32
    return %c0_i32, %arg0 : i32, i32
  }
  func.func @transform_2(%arg0: i32) -> (i32, i32) {
    %c0_i32 = arith.constant 0 : i32
    %c0_i32_0 = arith.constant 0 : i32
    %c0_i32_1 = arith.constant 0 : i32
    return %c0_i32, %c0_i32_0 : i32, i32
  }
  func.func @transform_3(%arg0: i32) -> (i32, i32) {
    %c0_i32 = arith.constant 0 : i32
    %c0_i32_0 = arith.constant 0 : i32
    %c0_i32_1 = arith.constant 0 : i32
    return %c0_i32, %c0_i32_0 : i32, i32
  }
  func.func @transform_4(%arg0: i32) -> (i32, i32, i32) {
    %c0_i32 = arith.constant 0 : i32
    %c0_i32_0 = arith.constant 0 : i32
    %c0_i32_1 = arith.constant 0 : i32
    %c0_i32_2 = arith.constant 0 : i32
    return %c0_i32, %c0_i32_0, %c0_i32_1 : i32, i32, i32
  }
  func.func @transform_5(%arg0: i32) -> (i32, i32, i32) {
    %c0_i32 = arith.constant 0 : i32
    %c0_i32_0 = arith.constant 0 : i32
    %c0_i32_1 = arith.constant 0 : i32
    %c0_i32_2 = arith.constant 0 : i32
    return %c0_i32, %c0_i32_0, %c0_i32_1 : i32, i32, i32
  }
  func.func @transform_6(%arg0: i32) -> (i32, i32) {
    %c0_i32 = arith.constant 0 : i32
    %c0_i32_0 = arith.constant 0 : i32
    %c0_i32_1 = arith.constant 0 : i32
    return %c0_i32, %c0_i32_0 : i32, i32
  }
  func.func @transform_7(%arg0: i32) -> (i32, i32) {
    %c0_i32 = arith.constant 0 : i32
    %c0_i32_0 = arith.constant 0 : i32
    %c0_i32_1 = arith.constant 0 : i32
    return %c0_i32, %c0_i32_0 : i32, i32
  }
  func.func @transform_8(%arg0: i32) -> (i32, i32) {
    %c0_i32 = arith.constant 0 : i32
    %c0_i32_0 = arith.constant 0 : i32
    return %c0_i32, %arg0 : i32, i32
  }
}

module attributes {stable_mosaic.version = 11 : i64} {
  func.func @ffn_kernel(%arg0: i32, %arg1: memref<4x512xbf16, #tpu.memory_space<vmem>>, %arg2: memref<32x512xbf16, #tpu.memory_space<vmem>>, %arg3: memref<32x4xbf16, #tpu.memory_space<vmem>>, %arg4: memref<32x1xf32, #tpu.memory_space<vmem>>, %arg5: memref<5x32x32xbf16, #tpu.memory_space<vmem>>, %arg6: memref<5x32x1xf32, #tpu.memory_space<vmem>>, %arg7: memref<4x32xbf16, #tpu.memory_space<vmem>>, %arg8: memref<4x1xf32, #tpu.memory_space<vmem>>, %arg9: memref<4x512xf32, #tpu.memory_space<vmem>>) attributes {dimension_semantics = [#tpu.dimension_semantics<parallel>], iteration_bounds = array<i64: 2>, scalar_prefetch = 0 : i64, scratch_operands = 0 : i64, tpu.core_type = #tpu.core_type<tc>, window_params = [{transform_indices = @transform_0, window_bounds = array<i64: 4, 512>}, {transform_indices = @transform_1, window_bounds = array<i64: 32, 512>}, {pipeline_mode = #tpu.pipeline_mode<synchronous>, transform_indices = @transform_2, window_bounds = array<i64: 32, 4>}, {pipeline_mode = #tpu.pipeline_mode<synchronous>, transform_indices = @transform_3, window_bounds = array<i64: 32, 1>}, {pipeline_mode = #tpu.pipeline_mode<synchronous>, transform_indices = @transform_4, window_bounds = array<i64: 5, 32, 32>}, {pipeline_mode = #tpu.pipeline_mode<synchronous>, transform_indices = @transform_5, window_bounds = array<i64: 5, 32, 1>}, {pipeline_mode = #tpu.pipeline_mode<synchronous>, transform_indices = @transform_6, window_bounds = array<i64: 4, 32>}, {pipeline_mode = #tpu.pipeline_mode<synchronous>, transform_indices = @transform_7, window_bounds = array<i64: 4, 1>}, {transform_indices = @transform_8, window_bounds = array<i64: 4, 512>}]} {
    %c0_i32 = arith.constant 0 : i32
    %c2_i32 = arith.constant 2 : i32
    %0 = arith.addi %c0_i32, %c2_i32 : i32
    %c1_i32 = arith.constant 1 : i32
    scf.for %arg10 = %c0_i32 to %0 step %c1_i32  : i32 {
      %c256_i32 = arith.constant 256 : i32
      %1 = arith.muli %arg10, %c256_i32 : i32
      %2 = tpu.assume_multiple %1, 256 : i32
      %c0 = arith.constant 0 : index
      %3 = arith.index_cast %2 : i32 to index
      %4 = vector.load %arg1[%c0, %3] : memref<4x512xbf16, #tpu.memory_space<vmem>>, vector<4x256xbf16>
      %c0_1 = arith.constant 0 : index
      %5 = arith.index_cast %2 : i32 to index
      %6 = vector.load %arg2[%c0_1, %5] : memref<32x512xbf16, #tpu.memory_space<vmem>>, vector<32x256xbf16>
      %c0_2 = arith.constant 0 : index
      %c0_3 = arith.constant 0 : index
      %7 = vector.load %arg3[%c0_2, %c0_3] : memref<32x4xbf16, #tpu.memory_space<vmem>>, vector<32x4xbf16>
      %cst = arith.constant dense<0.000000e+00> : vector<32x256xf32>
      %8 = tpu.matmul %7, %4, %cst {dimension_numbers = #tpu.dot_dimension_numbers<[1], [0], [0], [1], [0, 0, 1, 1], [], []>} : vector<32x4xbf16>, vector<4x256xbf16>, vector<32x256xf32> -> vector<32x256xf32>
      %c0_4 = arith.constant 0 : index
      %c0_5 = arith.constant 0 : index
      %9 = vector.load %arg4[%c0_4, %c0_5] : memref<32x1xf32, #tpu.memory_space<vmem>>, vector<32x1xf32>
      %10 = vector.broadcast %9 : vector<32x1xf32> to vector<32x256xf32>
      %11 = arith.addf %8, %10 : vector<32x256xf32>
      %12 = arith.extf %6 : vector<32x256xbf16> to vector<32x256xf32>
      %13 = arith.addf %11, %12 : vector<32x256xf32>
      %c0_6 = arith.constant 0 : index
      %c0_7 = arith.constant 0 : index
      %c0_8 = arith.constant 0 : index
      %14 = vector.load %arg5[%c0_6, %c0_7, %c0_8] : memref<5x32x32xbf16, #tpu.memory_space<vmem>>, vector<1x32x32xbf16>
      %15 = vector.shape_cast %14 : vector<1x32x32xbf16> to vector<32x32xbf16>
      %16 = arith.truncf %13 : vector<32x256xf32> to vector<32x256xbf16>
      %cst_9 = arith.constant dense<0.000000e+00> : vector<32x256xf32>
      %17 = tpu.matmul %15, %16, %cst_9 {dimension_numbers = #tpu.dot_dimension_numbers<[1], [0], [0], [1], [0, 0, 1, 1], [], []>} : vector<32x32xbf16>, vector<32x256xbf16>, vector<32x256xf32> -> vector<32x256xf32>
      %c0_10 = arith.constant 0 : index
      %c0_11 = arith.constant 0 : index
      %c0_12 = arith.constant 0 : index
      %18 = vector.load %arg6[%c0_10, %c0_11, %c0_12] : memref<5x32x1xf32, #tpu.memory_space<vmem>>, vector<1x32x1xf32>
      %19 = vector.shape_cast %18 : vector<1x32x1xf32> to vector<32x1xf32>
      %20 = vector.broadcast %19 : vector<32x1xf32> to vector<32x256xf32>
      %21 = arith.addf %17, %20 : vector<32x256xf32>
      %cst_13 = arith.constant 0.000000e+00 : f32
      %22 = vector.broadcast %cst_13 : f32 to vector<32x256xf32>
      %23 = arith.maximumf %21, %22 : vector<32x256xf32>
      %c1 = arith.constant 1 : index
      %c0_14 = arith.constant 0 : index
      %c0_15 = arith.constant 0 : index
      %24 = vector.load %arg5[%c1, %c0_14, %c0_15] : memref<5x32x32xbf16, #tpu.memory_space<vmem>>, vector<1x32x32xbf16>
      %25 = vector.shape_cast %24 : vector<1x32x32xbf16> to vector<32x32xbf16>
      %26 = arith.truncf %23 : vector<32x256xf32> to vector<32x256xbf16>
      %cst_16 = arith.constant dense<0.000000e+00> : vector<32x256xf32>
      %27 = tpu.matmul %25, %26, %cst_16 {dimension_numbers = #tpu.dot_dimension_numbers<[1], [0], [0], [1], [0, 0, 1, 1], [], []>} : vector<32x32xbf16>, vector<32x256xbf16>, vector<32x256xf32> -> vector<32x256xf32>
      %c1_17 = arith.constant 1 : index
      %c0_18 = arith.constant 0 : index
      %c0_19 = arith.constant 0 : index
      %28 = vector.load %arg6[%c1_17, %c0_18, %c0_19] : memref<5x32x1xf32, #tpu.memory_space<vmem>>, vector<1x32x1xf32>
      %29 = vector.shape_cast %28 : vector<1x32x1xf32> to vector<32x1xf32>
      %30 = vector.broadcast %29 : vector<32x1xf32> to vector<32x256xf32>
      %31 = arith.addf %27, %30 : vector<32x256xf32>
      %cst_20 = arith.constant 0.000000e+00 : f32
      %32 = vector.broadcast %cst_20 : f32 to vector<32x256xf32>
      %33 = arith.maximumf %31, %32 : vector<32x256xf32>
      %c2 = arith.constant 2 : index
      %c0_21 = arith.constant 0 : index
      %c0_22 = arith.constant 0 : index
      %34 = vector.load %arg5[%c2, %c0_21, %c0_22] : memref<5x32x32xbf16, #tpu.memory_space<vmem>>, vector<1x32x32xbf16>
      %35 = vector.shape_cast %34 : vector<1x32x32xbf16> to vector<32x32xbf16>
      %36 = arith.truncf %33 : vector<32x256xf32> to vector<32x256xbf16>
      %cst_23 = arith.constant dense<0.000000e+00> : vector<32x256xf32>
      %37 = tpu.matmul %35, %36, %cst_23 {dimension_numbers = #tpu.dot_dimension_numbers<[1], [0], [0], [1], [0, 0, 1, 1], [], []>} : vector<32x32xbf16>, vector<32x256xbf16>, vector<32x256xf32> -> vector<32x256xf32>
      %c2_24 = arith.constant 2 : index
      %c0_25 = arith.constant 0 : index
      %c0_26 = arith.constant 0 : index
      %38 = vector.load %arg6[%c2_24, %c0_25, %c0_26] : memref<5x32x1xf32, #tpu.memory_space<vmem>>, vector<1x32x1xf32>
      %39 = vector.shape_cast %38 : vector<1x32x1xf32> to vector<32x1xf32>
      %40 = vector.broadcast %39 : vector<32x1xf32> to vector<32x256xf32>
      %41 = arith.addf %37, %40 : vector<32x256xf32>
      %cst_27 = arith.constant 0.000000e+00 : f32
      %42 = vector.broadcast %cst_27 : f32 to vector<32x256xf32>
      %43 = arith.maximumf %41, %42 : vector<32x256xf32>
      %c3 = arith.constant 3 : index
      %c0_28 = arith.constant 0 : index
      %c0_29 = arith.constant 0 : index
      %44 = vector.load %arg5[%c3, %c0_28, %c0_29] : memref<5x32x32xbf16, #tpu.memory_space<vmem>>, vector<1x32x32xbf16>
      %45 = vector.shape_cast %44 : vector<1x32x32xbf16> to vector<32x32xbf16>
      %46 = arith.truncf %43 : vector<32x256xf32> to vector<32x256xbf16>
      %cst_30 = arith.constant dense<0.000000e+00> : vector<32x256xf32>
      %47 = tpu.matmul %45, %46, %cst_30 {dimension_numbers = #tpu.dot_dimension_numbers<[1], [0], [0], [1], [0, 0, 1, 1], [], []>} : vector<32x32xbf16>, vector<32x256xbf16>, vector<32x256xf32> -> vector<32x256xf32>
      %c3_31 = arith.constant 3 : index
      %c0_32 = arith.constant 0 : index
      %c0_33 = arith.constant 0 : index
      %48 = vector.load %arg6[%c3_31, %c0_32, %c0_33] : memref<5x32x1xf32, #tpu.memory_space<vmem>>, vector<1x32x1xf32>
      %49 = vector.shape_cast %48 : vector<1x32x1xf32> to vector<32x1xf32>
      %50 = vector.broadcast %49 : vector<32x1xf32> to vector<32x256xf32>
      %51 = arith.addf %47, %50 : vector<32x256xf32>
      %cst_34 = arith.constant 0.000000e+00 : f32
      %52 = vector.broadcast %cst_34 : f32 to vector<32x256xf32>
      %53 = arith.maximumf %51, %52 : vector<32x256xf32>
      %c4 = arith.constant 4 : index
      %c0_35 = arith.constant 0 : index
      %c0_36 = arith.constant 0 : index
      %54 = vector.load %arg5[%c4, %c0_35, %c0_36] : memref<5x32x32xbf16, #tpu.memory_space<vmem>>, vector<1x32x32xbf16>
      %55 = vector.shape_cast %54 : vector<1x32x32xbf16> to vector<32x32xbf16>
      %56 = arith.truncf %53 : vector<32x256xf32> to vector<32x256xbf16>
      %cst_37 = arith.constant dense<0.000000e+00> : vector<32x256xf32>
      %57 = tpu.matmul %55, %56, %cst_37 {dimension_numbers = #tpu.dot_dimension_numbers<[1], [0], [0], [1], [0, 0, 1, 1], [], []>} : vector<32x32xbf16>, vector<32x256xbf16>, vector<32x256xf32> -> vector<32x256xf32>
      %c4_38 = arith.constant 4 : index
      %c0_39 = arith.constant 0 : index
      %c0_40 = arith.constant 0 : index
      %58 = vector.load %arg6[%c4_38, %c0_39, %c0_40] : memref<5x32x1xf32, #tpu.memory_space<vmem>>, vector<1x32x1xf32>
      %59 = vector.shape_cast %58 : vector<1x32x1xf32> to vector<32x1xf32>
      %60 = vector.broadcast %59 : vector<32x1xf32> to vector<32x256xf32>
      %61 = arith.addf %57, %60 : vector<32x256xf32>
      %cst_41 = arith.constant 0.000000e+00 : f32
      %62 = vector.broadcast %cst_41 : f32 to vector<32x256xf32>
      %63 = arith.maximumf %61, %62 : vector<32x256xf32>
      %c0_42 = arith.constant 0 : index
      %c0_43 = arith.constant 0 : index
      %64 = vector.load %arg7[%c0_42, %c0_43] : memref<4x32xbf16, #tpu.memory_space<vmem>>, vector<4x32xbf16>
      %65 = arith.truncf %63 : vector<32x256xf32> to vector<32x256xbf16>
      %cst_44 = arith.constant dense<0.000000e+00> : vector<4x256xf32>
      %66 = tpu.matmul %64, %65, %cst_44 {dimension_numbers = #tpu.dot_dimension_numbers<[1], [0], [0], [1], [0, 0, 1, 1], [], []>} : vector<4x32xbf16>, vector<32x256xbf16>, vector<4x256xf32> -> vector<4x256xf32>
      %c0_45 = arith.constant 0 : index
      %c0_46 = arith.constant 0 : index
      %67 = vector.load %arg8[%c0_45, %c0_46] : memref<4x1xf32, #tpu.memory_space<vmem>>, vector<4x1xf32>
      %68 = vector.broadcast %67 : vector<4x1xf32> to vector<4x256xf32>
      %69 = arith.addf %66, %68 : vector<4x256xf32>
      %c0_47 = arith.constant 0 : index
      %70 = arith.index_cast %2 : i32 to index
      %71 = vector.load %arg9[%c0_47, %70] : memref<4x512xf32, #tpu.memory_space<vmem>>, vector<4x256xf32>
      tpu.vector_store %arg9[%c0_47, %70], %69 {strides = array<i32>} : memref<4x512xf32, #tpu.memory_space<vmem>>, vector<4x256xf32>,
    }
    %c2_i32_0 = arith.constant 2 : i32
    return
  }
  func.func @transform_0(%arg0: i32) -> (i32, i32) {
    %c0_i32 = arith.constant 0 : i32
    %c0_i32_0 = arith.constant 0 : i32
    return %c0_i32, %arg0 : i32, i32
  }
  func.func @transform_1(%arg0: i32) -> (i32, i32) {
    %c0_i32 = arith.constant 0 : i32
    %c0_i32_0 = arith.constant 0 : i32
    return %c0_i32, %arg0 : i32, i32
  }
  func.func @transform_2(%arg0: i32) -> (i32, i32) {
    %c0_i32 = arith.constant 0 : i32
    %c0_i32_0 = arith.constant 0 : i32
    %c0_i32_1 = arith.constant 0 : i32
    return %c0_i32, %c0_i32_0 : i32, i32
  }
  func.func @transform_3(%arg0: i32) -> (i32, i32) {
    %c0_i32 = arith.constant 0 : i32
    %c0_i32_0 = arith.constant 0 : i32
    %c0_i32_1 = arith.constant 0 : i32
    return %c0_i32, %c0_i32_0 : i32, i32
  }
  func.func @transform_4(%arg0: i32) -> (i32, i32, i32) {
    %c0_i32 = arith.constant 0 : i32
    %c0_i32_0 = arith.constant 0 : i32
    %c0_i32_1 = arith.constant 0 : i32
    %c0_i32_2 = arith.constant 0 : i32
    return %c0_i32, %c0_i32_0, %c0_i32_1 : i32, i32, i32
  }
  func.func @transform_5(%arg0: i32) -> (i32, i32, i32) {
    %c0_i32 = arith.constant 0 : i32
    %c0_i32_0 = arith.constant 0 : i32
    %c0_i32_1 = arith.constant 0 : i32
    %c0_i32_2 = arith.constant 0 : i32
    return %c0_i32, %c0_i32_0, %c0_i32_1 : i32, i32, i32
  }
  func.func @transform_6(%arg0: i32) -> (i32, i32) {
    %c0_i32 = arith.constant 0 : i32
    %c0_i32_0 = arith.constant 0 : i32
    %c0_i32_1 = arith.constant 0 : i32
    return %c0_i32, %c0_i32_0 : i32, i32
  }
  func.func @transform_7(%arg0: i32) -> (i32, i32) {
    %c0_i32 = arith.constant 0 : i32
    %c0_i32_0 = arith.constant 0 : i32
    %c0_i32_1 = arith.constant 0 : i32
    return %c0_i32, %c0_i32_0 : i32, i32
  }
  func.func @transform_8(%arg0: i32) -> (i32, i32) {
    %c0_i32 = arith.constant 0 : i32
    %c0_i32_0 = arith.constant 0 : i32
    return %c0_i32, %arg0 : i32, i32
  }
}

</mosaic_0001>

<bundles_post_ra>
// kernel: tpu_custom_call.1
= control target key start
LH: loop header
LB: loop body
LE: loop exit
PB: predicated region body
PF: predicated region fallthrough
CT: control target
= control target key end

     0   :  { %s1752_s0 = inlined_call_operand.vmem [shape: bf16[4,1024], index: 0, kind: input, shape index: {}]   ;;  %s1753_s1 = inlined_call_operand.vmem [shape: bf16[32,1024], index: 1, kind: input, shape index: {}]   ;;  %s1754_s2 = inlined_call_operand.vmem [shape: bf16[32,4], index: 2, kind: input, shape index: {}]   ;;  %s1755_s3 = inlined_call_operand.vmem [shape: f32[32,1], index: 3, kind: input, shape index: {}]   ;;  %s1756_s4 = inlined_call_operand.hbm [shape: bf16[5,32,32], index: 4, kind: input, shape index: {}]   ;;  %s1757_s5 = inlined_call_operand.vmem [shape: f32[5,32,1], index: 5, kind: input, shape index: {}]   ;;  %s1758_s6 = inlined_call_operand.vmem [shape: bf16[4,32], index: 6, kind: input, shape index: {}]   ;;  %s1759_s7 = inlined_call_operand.vmem [shape: f32[4,1], index: 7, kind: input, shape index: {}]   ;;  %s1760_s8 = inlined_call_operand.hbm [shape: f32[4,1024], index: 8, kind: output, shape index: {}]  }
   0x1   :  { %1761 = sst [smem:[#allocation9_spill]] %s1752_s0 }
   0x2   :  { %1762 = sst [smem:[#allocation10_spill]] %s1753_s1 }
   0x3   :  { %1763 = sst [smem:[#allocation11_spill]] %s1755_s3 }
   0x4   :  { %13 = vsyncpa [#allocation4], 0 }
   0x5   :  { %14 = vsyncpa [#allocation5], 0 }
   0x6   :  { %16 = vsyncpa [#allocation5 + $0x1], 0  ;;  %s1496_s27 = smov 0   ;;  %s1498_s28 = smov 0  }
   0x7   :  { %s1500_s29 = smov 0   ;;  %s1502_s30 = smov 0  }
   0x8 LB: > { %s1517_s9 = sadd.s32 4294967295, %s1441_s30   ;;  %s1151_s10 = sadd.s32 4294967294, %s1441_s30   ;;  %s1441_s30 = sphi %s1502_s30, %s1774_s30   ;;  %s1437_s29 = sphi %s1500_s29, %s1773_s29   ;;  %s1433_s28 = sphi %s1498_s28, %s1772_s28   ;;  %s1429_s27 = sphi %s1496_s27, %s1771_s27  }
   0x9   : > { %s1521_s11 = sadd.s32 1, %s1441_s30   ;;  %s55_s12 = sadd.s32 1, %s1437_s29 }
   0xa   : > { %s52_s13 = ssub.s32 %s1441_s30, %s1521_s11  ;;  %p62_p0 = scmp.ne.s32.totalorder %s1437_s29, %s1433_s28 }
   0xb   : > { %p53_p1 = scmp.eq.s32.totalorder %s52_s13, 0  ;;  %p63_p2 = scmp.eq.s32.totalorder %s1441_s30, 0 }
   0xc   : > { %p218_p3 = scmp.eq.s32.totalorder %s1517_s9, 1  ;;  %p223_p4 = scmp.ne.s32.totalorder %s1433_s28, %s1429_s27 }
   0xd   : > { %s1533_s14 = scalar_select %p53_p1, %s1437_s29, %s55_s12  }
   0xe   : > { %p1535_p5 = por %p63_p2, %p62_p0  ;;  %p1539_p6 = por %p218_p3, %p62_p0 }
   0xf   : > { %p224_p7 = scmp.eq.s32.totalorder %s1151_s10, 1  ;;  %p1152_p8 = scmp.ge.s32.totalorder %s1441_s30, 1 }
  0x10   : > { %p231_p9 = scmp.lt.s32.totalorder %s1441_s30, 3  ;;  %p1291_p11 = scmp.eq.s32.totalorder %s1517_s9, 0 }
  0x11   : > { %p1545_p10 = por %p224_p7, %p223_p4  ;;  %s248_s21 = sshll.u32 %s1756_s4, 4  ;;  %s249_s21 = int_to_ptr.hbm [resolvable:$true] %s248_s21 }
  0x12   : > { %p1550_p12 = pnand %p1152_p8, %p231_p9  ;;  %s1447_s22 = smov [#allocation3]  }
  0x13   : > { %s250_s23 = sshll.u32 %s1447_s22, 4  ;;  %s1448_s24 = smov 64   ;;  %s251_s23 = int_to_ptr.vmem [resolvable:$true] %s250_s23 }
  0x14   : > { %p1283_p13 = pneg %p1550_p12  ;;  %s1449_s25 = smov 4  }
  0x15   : > { %p1154_p1 = scmp.ge.s32.totalorder %s1441_s30, 2 }
  0x16   : > { %p1284_p0 = pnand %p1291_p11, %p1283_p13 }
  0x17   : > { %269 = sbr.rel (%p1154_p1) target bundleno = 46 (0x2e), region = 40 }
  0x18   : > { %1286 = dma.hbm_to_vmem [thread:$0]  (!%p1284_p0), %s249_s21, 1280, %s251_s23, [#allocation4], %s1448_s24, %s1448_s24, %s1449_s25  }
  0x1c   : > { %281 = sbr.rel (!%p1535_p5) target bundleno = 46 (0x2e), region = 48  ;;  %s283_s26 = sand.u32 (%p1535_p5), 1, %s1437_s29  }
  0x1d   : > { %s1263_s10 = sshll.u32 (%p1535_p5), %s1441_s30, 4  ;;  %s1155_s12 = sshll.u32 (%p1535_p5), %s283_s26, 6 }
  0x1e   : > { %s1768_s1 = sld [smem:[#allocation10_spill]] (%p1535_p5)  ;;  %s285_s21 = scalar_lea.vmem (%p1535_p5), [#allocation2], %s1155_s12 }
  0x24   : > { %s288_s20 = scalar_lea.vmem %s1768_s1, %s1263_s10 }
  0x25   : > { %v301_v0 = vld [vmem:[%s288_s20] sm:$0xff]  ;;  %v303_v1 = vld [vmem:[%s288_s20 + $0x8] sm:$0xff] }
  0x26   : > { %v305_v2 = vld [vmem:[%s288_s20 + $0x20] sm:$0xff]  ;;  %302 = vst [vmem:[%s285_s21] sm:$0xff] %v301_v0  ;;  %v307_v3 = vld [vmem:[%s288_s20 + $0x28] sm:$0xff] }
  0x27   : > { %304 = vst [vmem:[%s285_s21 + $0x8] sm:$0xff] %v303_v1  ;;  %v309_v4 = vld [vmem:[%s288_s20 + $0x40] sm:$0xff]  ;;  %v311_v5 = vld [vmem:[%s288_s20 + $0x48] sm:$0xff] }
  0x28   : > { %306 = vst [vmem:[%s285_s21 + $0x10] sm:$0xff] %v305_v2  ;;  %v313_v6 = vld [vmem:[%s288_s20 + $0x60] sm:$0xff]  ;;  %v315_v7 = vld [vmem:[%s288_s20 + $0x68] sm:$0xff] }
  0x29   : > { %308 = vst [vmem:[%s285_s21 + $0x18] sm:$0xff] %v307_v3 }
  0x2a   : > { %310 = vst [vmem:[%s285_s21 + $0x20] sm:$0xff] %v309_v4 }
  0x2b   : > { %312 = vst [vmem:[%s285_s21 + $0x28] sm:$0xff] %v311_v5 }
  0x2c   : > { %314 = vst [vmem:[%s285_s21 + $0x30] sm:$0xff] %v313_v6 }
  0x2d   : > { %316 = vst [vmem:[%s285_s21 + $0x38] sm:$0xff] %v315_v7 }
  0x2e PF: > { %325 = sbr.rel (%p1550_p12) target bundleno = 1209 (0x4b9), region = 71  ;;  %s1574_s15 = sand.u32 (!%p1550_p12), 1, %s1433_s28  }
  0x2f   : > { %s1159_s22 = sshll.u32 (!%p1550_p12), %s1574_s15, 6 }
  0x30   : > { %s1577_s23 = scalar_lea.vmem (!%p1550_p12), [#allocation2], %s1159_s22 }
  0x33   : > { %1420 = dma.done.wait (%p1291_p11), [#allocation4], 1280  }
  0x34   : > { %1422 = vsyncadd (%p1291_p11), [#allocation4], 4294966016  ;;  %s1161_s24 = sshll.u32 %s1574_s15, 4  ;;  %s1162_s25 = sshll.u32 %s1517_s9, 2 }
  0x35   : > { %p372_p2 = scmp.lt.s32.totalorder %s1162_s25, 7  ;;  %s1769_s0 = sld [smem:[#allocation9_spill]] }
  0x36   : > { %s1590_s13 = scalar_lea.vmem [#allocation6], %s1161_s24  ;;  %s1592_s19 = smov 0  }
  0x37   : > { %s1776_s25 = smov (!%p372_p2, %s1162_s25), 7 }
  0x38   : > { %s1163_s18 = sshll.u32 %s1776_s25, 1 }
  0x3b   : > { %s1588_s12 = scalar_lea.vmem %s1769_s0, %s1163_s18 }
  0x3c LB: >> { %s1770_s3 = sld [smem:[#allocation11_spill]]  ;;  %v1450_v10 = vmov 0   ;;  %s1164_s24 = sshll.u32 %s1445_s19, 8  ;;  %vm447_vm0 = vcmask 1041408   ;;  %v514_v18 = vld [vmem:[%s1757_s5] sm:$0xff]  ;;  %v515_v19 = vld [vmem:[%s1757_s5 + $0x8] sm:$0xff]  ;;  %s1445_s19 = sphi %s1592_s19, %s385_s19  }
  0x3d   : >> { %1339 = vset.pattern.permute.xlu1 %v1450_v10  ;;  %1338 = vset.pattern.permute.xlu0 %v1450_v10  ;;  %s1604_s18 = sshra.s32 %s1164_s24, 7  ;;  %v1264_v20 = vld [vmem:[%s1754_s2] sm:$0xff]  ;;  %vm440_vm1 = vcmask 31744   ;;  %v1194_v21 = vld [vmem:[%s1757_s5 + $0x38] sm:$0xff]  ;;  %v1209_v23 = vld [vmem:[%s1757_s5 + $0x50] sm:$0xff]  ;;  %vm548_vm2 = vcmask 261120  }
  0x3e   : >> { %1340 = vset.pattern.permute.xlu2 %v1450_v10  ;;  %s1165_s26 = sshll.u32 %s1604_s18, 1  ;;  %v1191_v22 = vld [vmem:[%s1757_s5 + $0x20] sm:$0xff]  ;;  %v1210_v24 = vld [vmem:[%s1757_s5 + $0x58] sm:$0xff]  ;;  %v1265_v25 = vld [vmem:[%s1754_s2 + $0x8] sm:$0xff]  ;;  %s1166_s20 = sshll.u32 %s1604_s18, 2  ;;  %vm1028_vm3 = vcmask 1043456  }
  0x3f   : >> { %s390_s10 = scalar_lea.vmem %s1588_s12, %s1165_s26  ;;  %v1208_v26 = vld [vmem:[%s1757_s5 + $0x48] sm:$0xff]  ;;  %v1225_v27 = vld [vmem:[%s1757_s5 + $0x70] sm:$0xff]  ;;  %v1223_v28 = vld [vmem:[%s1757_s5 + $0x60] sm:$0xff]  ;;  %s393_s21 = scalar_lea.vmem %s1577_s23, %s1166_s20 [#allocation2] }
  0x40   : >> { %v391_v11 = vld [vmem:[%s390_s10] sm:$0xf]  ;;  %v1224_v29 = vld [vmem:[%s1757_s5 + $0x68] sm:$0xff]  ;;  %v1242_v30 = vld [vmem:[%s1757_s5 + $0x98] sm:$0xff]  ;;  %s1032_s10 = scalar_lea.vmem %s1590_s13, %s1166_s20 [#allocation6]  ;;  %s385_s19 = sadd.s32 1, %s1445_s19  }
  0x41   : >> { %437 = vst [vmem:[#allocation1] ss:$4 sm:$0xff] %v391_v11  ;;  %v1239_v31 = vld [vmem:[%s1757_s5 + $0x80] sm:$0xff]  ;;  %v516_v35 = vld [vmem:[%s1757_s5 + $0x10] sm:$0xff]  ;;  %v517_v38 = vld [vmem:[%s1757_s5 + $0x18] sm:$0xff]  ;;  %p382_p3 = scmp.ge.s32.totalorder %s385_s19, 2  }
  0x42   : >> { %v404_v8 = vld [vmem:[%s1770_s3 + $0x10] sm:$0xff]  ;;  %v402_v9 = vld [vmem:[%s1770_s3] sm:$0xff]  ;;  %v405_v12 = vld [vmem:[%s1770_s3 + $0x18] sm:$0xff]  ;;  %530 = vperm.xlu2 %1340, %v516_v35   ;;  %s1276_s1 = sshll.u32 (%p382_p3), %s1517_s9, 4  ;;  %s1048_s20 = sshll.u32 (%p382_p3), %s1590_s13, 4  ;;  %s1049_s20 = int_to_ptr.vmem [resolvable:$true] %s1048_s20 }
  0x43   : >> { %418 = vperm.xlu0 %1338, %v404_v8   ;;  %408 = vperm.xlu1 %1339, %v402_v9   ;;  %v403_v13 = vld [vmem:[%s1770_s3 + $0x8] sm:$0xff]  ;;  %v990_v32 = vld [vmem:[%s1759_s7] sm:$0xf]  ;;  %v397_v44 = vld [vmem:[%s393_s21 + $0x30] sm:$0xff]  ;;  %s1046_s18 = scalar_lea.hbm (%p382_p3), %s1760_s8, %s1276_s1  ;;  %s1035_s22 = scalar_lea.sflag (%p382_p3), [#allocation5], %s1574_s15 }
  0x44   : >> { %v396_v43 = vld [vmem:[%s393_s21 + $0x20] sm:$0xff]  ;;  %v395_v45 = vld [vmem:[%s393_s21 + $0x10] sm:$0xff]  ;;  %v496_v54 = vunpack.c.l.bf16 %v397_v44  ;;  %v497_v55 = vunpack.c.h.bf16 %v397_v44  ;;  %s1050_s0 = sshll.u32 (%p382_p3), %s1046_s18, 4  ;;  %s1391_s9 = scalar_lea.hbm (%p382_p3), %s1760_s8, 32  ;;  %s1051_s0 = int_to_ptr.hbm [resolvable:$true] %s1050_s0 }
  0x45   : >> { %v494_v46 = vunpack.c.l.bf16 %v396_v43  ;;  %v495_v47 = vunpack.c.h.bf16 %v396_v43  ;;  %v1193_v48 = vld [vmem:[%s1757_s5 + $0x30] sm:$0xff]  ;;  %v394_v51 = vld [vmem:[%s393_s21] sm:$0xff]  ;;  %v492_v56 = vunpack.c.l.bf16 %v395_v45  ;;  %v493_v57 = vunpack.c.h.bf16 %v395_v45  ;;  %s1385_s25 = sshra.s32 (%p382_p3), %s1051_s0, 4  ;;  %s1386_s25 = int_to_ptr.hbm [resolvable:$true] %s1385_s25 }
  0x46   : >> { %v490_v1 = vunpack.c.l.bf16 %v394_v51  ;;  %v491_v3 = vunpack.c.h.bf16 %v394_v51  ;;  %s1387_s24 = scalar_lea.hbm (%p382_p3), %s1386_s25, 16  ;;  %p1392_p8 = scmp.lt.s32.totalorder (%p382_p3), %s1386_s25, %s1760_s8 }
  0x47   : > { %p1388_p4 = scmp.ne.s32.totalorder (%p382_p3), %s1386_s25, %s1387_s24  ;;  %p1393_p9 = scmp.lt.s32.totalorder (%p382_p3), %s1391_s9, %s1387_s24 }
  0x48   : >> { %v438_v14 = vld.sshfl [vmem:[#allocation1] sm:$0xff pattern:$0x73625140]  ;;  %v439_v15 = vld.sshfl [vmem:[#allocation1 + $0x8] sm:$0xff pattern:$0x73625140] }
  0x49   : >> { %v448_v16 = vsel %vm447_vm0, %v438_v14, 0  ;;  %v450_v17 = vsel %vm447_vm0, %v439_v15, 0  ;;  %p1389_p5 = pnand (%p382_p3), %p1388_p4, %p1539_p6  ;;  %p1394_p11 = por (%p382_p3), %p1393_p9, %p1392_p8 }
  0x4a   : >> { %459 = vmatpush.bf16.msra.mxu0 %v448_v16  ;;  %478 = vmatpush.bf16.msra.mxu1 %v450_v17  ;;  %v1266_v17 = vld [vmem:[#allocation3] sm:$0xff] }
  0x4b   : >> { %423 = vperm.xlu0 %1338, %v405_v12   ;;  %413 = vperm.xlu1 %1339, %v403_v13   ;;  %v1192_v12 = vld [vmem:[%s1757_s5 + $0x28] sm:$0xff]  ;;  %p1390_p7 = pneg (%p382_p3), %p1389_p5 }
  0x4c   : >> { %535 = vperm.xlu2 %1340, %v517_v38  }
  0x4d   : >> { %1175 = vmatmul.msk.bf16.vlgmr.msra.gmra.mxu0 %vm440_vm1, %v1264_v20  ;;  %1177 = vmatmul.msk.bf16.vlgmr.msra.gmra.mxu1 %vm440_vm1, %v1264_v20  ;;  %v1267_v20 = vld [vmem:[#allocation3 + $0x8] sm:$0xff]  ;;  %p1395_p12 = pnand (%p382_p3), %p1394_p11, %p1390_p7 }
  0x53   : >> { %520 = vperm.xlu0 %1338, %v514_v18   ;;  %525 = vperm.xlu1 %1339, %v515_v19   ;;  %v1207_v18 = vld [vmem:[%s1757_s5 + $0x40] sm:$0xff]  ;;  %v1226_v19 = vld [vmem:[%s1757_s5 + $0x78] sm:$0xff] }
  0x54   : >> { %627 = vperm.xlu2 %1340, %v1193_v48  }
  0x5b   : >> { %632 = vperm.xlu0 %1338, %v1194_v21   ;;  %617 = vperm.xlu1 %1339, %v1191_v22   ;;  %v1241_v21 = vld [vmem:[%s1757_s5 + $0x90] sm:$0xff]  ;;  %v1240_v22 = vld [vmem:[%s1757_s5 + $0x88] sm:$0xff] }
  0x5c   : >> { %622 = vperm.xlu2 %1340, %v1192_v12  }
  0x5d   : >> { %1176 = vmatmul.msk.bf16.gmra.mxu0 %vm440_vm1, %v1265_v25  ;;  %1178 = vmatmul.msk.bf16.gmra.mxu1 %vm440_vm1, %v1265_v25 }
  0x63   : >> { %723 = vperm.xlu0 %1338, %v1209_v23   ;;  %728 = vperm.xlu1 %1339, %v1210_v24  }
  0x64   : >> { %713 = vperm.xlu2 %1340, %v1207_v18  }
  0x6b   : >> { %718 = vperm.xlu0 %1338, %v1208_v26   ;;  %819 = vperm.xlu1 %1339, %v1225_v27  }
  0x6c   : >> { %824 = vperm.xlu2 %1340, %v1226_v19  }
  0x73   : >> { %809 = vperm.xlu0 %1338, %v1223_v28   ;;  %814 = vperm.xlu1 %1339, %v1224_v29  }
  0x74   : >> { %915 = vperm.xlu2 %1340, %v1241_v21  }
  0x7b   : >> { %920 = vperm.xlu0 %1338, %v1242_v30   ;;  %905 = vperm.xlu1 %1339, %v1239_v31  }
  0x7c   : >> { %910 = vperm.xlu2 %1340, %v1240_v22  }
  0x83   : >> { %993 = vperm.xlu0 %1338, %v990_v32  }
  0x9c   : >> { %v531_v27 = vpop.permute.xlu2 %530 }
  0xa6   : >> { %v536_v31 = vpop.permute.xlu2 %535 }
  0xb5   : >> { %v419_v39 = vpop.permute.xlu0 %418  ;;  %v409_v40 = vpop.permute.xlu1 %408 }
  0xbd   : >> { %v424_v49 = vpop.permute.xlu0 %423  ;;  %v414_v50 = vpop.permute.xlu1 %413 }
  0xc5   : >> { %v526_v30 = vpop.permute.xlu1 %525 }
  0xca   : >> { %v461_v33 = vpop.f32.mrf.mxu0  ;;  %v480_v34 = vpop.f32.mrf.mxu1 }
  0xcb   : >> { %v462_v0 = vadd.f32 %v461_v33, %v409_v40  ;;  %v481_v2 = vadd.f32 %v480_v34, %v409_v40 }
  0xcd   : >> { %v498_v13 = vadd.f32 %v490_v1, %v462_v0  ;;  %v499_v14 = vadd.f32 %v491_v3, %v481_v2 }
  0xd2   : >> { %v463_v36 = vpop.f32.mrf.mxu0  ;;  %v482_v37 = vpop.f32.mrf.mxu1 }
  0xd3   : >> { %v464_v60 = vadd.f32 %v463_v36, %v414_v50  ;;  %v483_v61 = vadd.f32 %v482_v37, %v414_v50  ;;  %v521_v36 = vpop.permute.xlu0 %520 }
  0xd5   : >> { %v500_v8 = vadd.f32 %v492_v56, %v464_v60  ;;  %v501_v9 = vadd.f32 %v493_v57, %v483_v61  ;;  %v1269_v56 = vld [vmem:[#allocation3 + $0x18] sm:$0xff]  ;;  %v628_v61 = vpop.permute.xlu2 %627 }
  0xd7   : >> { %v510_v15 = vpack.c.bf16 %v500_v8, %v498_v13  ;;  %v511_v16 = vpack.c.bf16 %v501_v9, %v499_v14 }
  0xda   : >> { %v466_v41 = vpop.f32.mrf.mxu0  ;;  %v485_v42 = vpop.f32.mrf.mxu1 }
  0xdb   : >> { %v467_v52 = vadd.f32 %v466_v41, %v419_v39  ;;  %v486_v53 = vadd.f32 %v485_v42, %v419_v39  ;;  %v633_v0 = vpop.permute.xlu0 %632 }
  0xdd   : >> { %v502_v4 = vadd.f32 %v494_v46, %v467_v52  ;;  %v503_v6 = vadd.f32 %v495_v47, %v486_v53  ;;  %v623_v1 = vpop.permute.xlu2 %622 }
  0xe2   : >> { %v468_v58 = vpop.f32.mrf.mxu0  ;;  %v487_v59 = vpop.f32.mrf.mxu1 }
  0xe3   : >> { %v469_v62 = vadd.f32 %v468_v58, %v424_v49  ;;  %v488_v63 = vadd.f32 %v487_v59, %v424_v49 }
  0xe5   : >> { %v504_v5 = vadd.f32 %v496_v54, %v469_v62  ;;  %v505_v7 = vadd.f32 %v497_v55, %v488_v63  ;;  %v1268_v55 = vld [vmem:[#allocation3 + $0x10] sm:$0xff] }
  0xe7   : >> { %v512_v10 = vpack.c.bf16 %v504_v5, %v502_v4  ;;  %v513_v11 = vpack.c.bf16 %v505_v7, %v503_v6  ;;  %v618_v6 = vpop.permute.xlu1 %617 }
  0xe9   : >> { %561 = vmatpush.bf16.msra.mxu2 %v512_v10  ;;  %580 = vmatpush.bf16.msra.mxu3 %v513_v11 }
  0xed   : >> { %562 = vmatpush.bf16.msra.mxu2 %v510_v15  ;;  %581 = vmatpush.bf16.msra.mxu3 %v511_v16 }
  0xf0   : >> { %1187 = vmatmul.msk.bf16.vlgmr.msra.gmra.mxu2 %vm548_vm2, %v1266_v17  ;;  %1189 = vmatmul.msk.bf16.vlgmr.msra.gmra.mxu3 %vm548_vm2, %v1266_v17 }
 0x100   : >> { %1188 = vmatmul.msk.bf16.gmra.mxu2 %vm548_vm2, %v1267_v20  ;;  %1190 = vmatmul.msk.bf16.gmra.mxu3 %vm548_vm2, %v1267_v20 }
 0x173   : >> { %v564_v23 = vpop.f32.mrf.mxu2  ;;  %v583_v24 = vpop.f32.mrf.mxu3 }
 0x174   : >> { %v565_v41 = vadd.f32 %v564_v23, %v521_v36  ;;  %v584_v42 = vadd.f32 %v583_v24, %v521_v36 }
 0x176   : >> { %v593_v51 = vmax.f32 %v565_v41, 0.0  ;;  %v594_v52 = vmax.f32 %v584_v42, 0.0 }
 0x17b   : >> { %v566_v25 = vpop.f32.mrf.mxu2  ;;  %v585_v26 = vpop.f32.mrf.mxu3 }
 0x17c   : >> { %v567_v37 = vadd.f32 %v566_v25, %v526_v30  ;;  %v586_v38 = vadd.f32 %v585_v26, %v526_v30  ;;  %v1270_v25 = vld [vmem:[#allocation3 + $0x20] sm:$0xff]  ;;  %v1271_v26 = vld [vmem:[#allocation3 + $0x28] sm:$0xff] }
 0x17e   : >> { %v595_v47 = vmax.f32 %v567_v37, 0.0  ;;  %v596_v48 = vmax.f32 %v586_v38, 0.0 }
 0x180   : >> { %v606_v53 = vpack.c.bf16 %v595_v47, %v593_v51  ;;  %v607_v54 = vpack.c.bf16 %v596_v48, %v594_v52 }
 0x183   : >> { %v569_v28 = vpop.f32.mrf.mxu2  ;;  %v588_v29 = vpop.f32.mrf.mxu3 }
 0x184   : >> { %v570_v32 = vadd.f32 %v569_v28, %v531_v27  ;;  %v589_v33 = vadd.f32 %v588_v29, %v531_v27 }
 0x186   : >> { %v597_v43 = vmax.f32 %v570_v32, 0.0  ;;  %v598_v44 = vmax.f32 %v589_v33, 0.0 }
 0x18b   : >> { %v571_v34 = vpop.f32.mrf.mxu2  ;;  %v590_v35 = vpop.f32.mrf.mxu3 }
 0x18c   : >> { %v572_v39 = vadd.f32 %v571_v34, %v536_v31  ;;  %v591_v40 = vadd.f32 %v590_v35, %v536_v31  ;;  %v724_v31 = vpop.permute.xlu0 %723  ;;  %v729_v34 = vpop.permute.xlu1 %728 }
 0x18e   : >> { %v599_v45 = vmax.f32 %v572_v39, 0.0  ;;  %v600_v46 = vmax.f32 %v591_v40, 0.0  ;;  %v714_v40 = vpop.permute.xlu2 %713 }
 0x190   : >> { %v608_v49 = vpack.c.bf16 %v599_v45, %v597_v43  ;;  %v609_v50 = vpack.c.bf16 %v600_v46, %v598_v44 }
 0x192   : >> { %657 = vmatpush.bf16.msrb.mxu0 %v608_v49  ;;  %676 = vmatpush.bf16.msrb.mxu1 %v609_v50 }
 0x194   : >> { %v719_v35 = vpop.permute.xlu0 %718 }
 0x196   : >> { %658 = vmatpush.bf16.msrb.mxu0 %v606_v53  ;;  %677 = vmatpush.bf16.msrb.mxu1 %v607_v54 }
 0x199   : >> { %1203 = vmatmul.msk.bf16.vlgmr.msrb.gmra.mxu0 %vm548_vm2, %v1268_v55  ;;  %1205 = vmatmul.msk.bf16.vlgmr.msrb.gmra.mxu1 %vm548_vm2, %v1268_v55 }
 0x1a9   : >> { %1204 = vmatmul.msk.bf16.gmra.mxu0 %vm548_vm2, %v1269_v56  ;;  %1206 = vmatmul.msk.bf16.gmra.mxu1 %vm548_vm2, %v1269_v56 }
 0x216   : >> { %v660_v57 = vpop.f32.mrf.mxu0  ;;  %v679_v58 = vpop.f32.mrf.mxu1 }
 0x217   : >> { %v661_v11 = vadd.f32 %v660_v57, %v618_v6  ;;  %v680_v12 = vadd.f32 %v679_v58, %v618_v6 }
 0x219   : >> { %v689_v21 = vmax.f32 %v661_v11, 0.0  ;;  %v690_v22 = vmax.f32 %v680_v12, 0.0 }
 0x21e   : >> { %v662_v59 = vpop.f32.mrf.mxu0  ;;  %v681_v60 = vpop.f32.mrf.mxu1 }
 0x21f   : >> { %v663_v7 = vadd.f32 %v662_v59, %v623_v1  ;;  %v682_v8 = vadd.f32 %v681_v60, %v623_v1  ;;  %v1272_v59 = vld [vmem:[#allocation3 + $0x30] sm:$0xff]  ;;  %v1273_v60 = vld [vmem:[#allocation3 + $0x38] sm:$0xff]  ;;  %v820_v1 = vpop.permute.xlu1 %819 }
 0x221   : >> { %v691_v17 = vmax.f32 %v663_v7, 0.0  ;;  %v692_v18 = vmax.f32 %v682_v8, 0.0 }
 0x223   : >> { %v702_v23 = vpack.c.bf16 %v691_v17, %v689_v21  ;;  %v703_v24 = vpack.c.bf16 %v692_v18, %v690_v22 }
 0x226   : >> { %v665_v62 = vpop.f32.mrf.mxu0  ;;  %v684_v63 = vpop.f32.mrf.mxu1 }
 0x227   : >> { %v666_v2 = vadd.f32 %v665_v62, %v628_v61  ;;  %v685_v3 = vadd.f32 %v684_v63, %v628_v61 }
 0x229   : >> { %v693_v13 = vmax.f32 %v666_v2, 0.0  ;;  %v694_v14 = vmax.f32 %v685_v3, 0.0 }
 0x22e   : >> { %v667_v4 = vpop.f32.mrf.mxu0  ;;  %v686_v5 = vpop.f32.mrf.mxu1 }
 0x22f   : >> { %v668_v9 = vadd.f32 %v667_v4, %v633_v0  ;;  %v687_v10 = vadd.f32 %v686_v5, %v633_v0  ;;  %v815_v4 = vpop.permute.xlu1 %814  ;;  %v825_v5 = vpop.permute.xlu2 %824 }
 0x231   : >> { %v695_v15 = vmax.f32 %v668_v9, 0.0  ;;  %v696_v16 = vmax.f32 %v687_v10, 0.0  ;;  %v810_v10 = vpop.permute.xlu0 %809 }
 0x233   : >> { %v704_v19 = vpack.c.bf16 %v695_v15, %v693_v13  ;;  %v705_v20 = vpack.c.bf16 %v696_v16, %v694_v14 }
 0x235   : >> { %753 = vmatpush.bf16.msrb.mxu2 %v704_v19  ;;  %772 = vmatpush.bf16.msrb.mxu3 %v705_v20 }
 0x239   : >> { %754 = vmatpush.bf16.msrb.mxu2 %v702_v23  ;;  %773 = vmatpush.bf16.msrb.mxu3 %v703_v24 }
 0x23c   : >> { %1219 = vmatmul.msk.bf16.vlgmr.msrb.gmra.mxu2 %vm548_vm2, %v1270_v25  ;;  %1221 = vmatmul.msk.bf16.vlgmr.msrb.gmra.mxu3 %vm548_vm2, %v1270_v25 }
 0x24c   : >> { %1220 = vmatmul.msk.bf16.gmra.mxu2 %vm548_vm2, %v1271_v26  ;;  %1222 = vmatmul.msk.bf16.gmra.mxu3 %vm548_vm2, %v1271_v26 }
 0x2bf   : >> { %v756_v27 = vpop.f32.mrf.mxu2  ;;  %v775_v28 = vpop.f32.mrf.mxu3 }
 0x2c0   : >> { %v757_v45 = vadd.f32 %v756_v27, %v714_v40  ;;  %v776_v46 = vadd.f32 %v775_v28, %v714_v40 }
 0x2c2   : >> { %v785_v55 = vmax.f32 %v757_v45, 0.0  ;;  %v786_v56 = vmax.f32 %v776_v46, 0.0 }
 0x2c7   : >> { %v758_v29 = vpop.f32.mrf.mxu2  ;;  %v777_v30 = vpop.f32.mrf.mxu3 }
 0x2c8   : >> { %v759_v41 = vadd.f32 %v758_v29, %v719_v35  ;;  %v778_v42 = vadd.f32 %v777_v30, %v719_v35  ;;  %v1274_v29 = vld [vmem:[#allocation3 + $0x40] sm:$0xff]  ;;  %v1275_v30 = vld [vmem:[#allocation3 + $0x48] sm:$0xff]  ;;  %v916_v35 = vpop.permute.xlu2 %915 }
 0x2ca   : >> { %v787_v51 = vmax.f32 %v759_v41, 0.0  ;;  %v788_v52 = vmax.f32 %v778_v42, 0.0 }
 0x2cc   : >> { %v798_v57 = vpack.c.bf16 %v787_v51, %v785_v55  ;;  %v799_v58 = vpack.c.bf16 %v788_v52, %v786_v56 }
 0x2cf   : >> { %v761_v32 = vpop.f32.mrf.mxu2  ;;  %v780_v33 = vpop.f32.mrf.mxu3 }
 0x2d0   : >> { %v762_v36 = vadd.f32 %v761_v32, %v724_v31  ;;  %v781_v37 = vadd.f32 %v780_v33, %v724_v31 }
 0x2d2   : >> { %v789_v47 = vmax.f32 %v762_v36, 0.0  ;;  %v790_v48 = vmax.f32 %v781_v37, 0.0 }
 0x2d7   : >> { %v763_v38 = vpop.f32.mrf.mxu2  ;;  %v782_v39 = vpop.f32.mrf.mxu3 }
 0x2d8   : >> { %v764_v43 = vadd.f32 %v763_v38, %v729_v34  ;;  %v783_v44 = vadd.f32 %v782_v39, %v729_v34  ;;  %v921_v38 = vpop.permute.xlu0 %920  ;;  %v911_v39 = vpop.permute.xlu2 %910 }
 0x2da   : >> { %v791_v49 = vmax.f32 %v764_v43, 0.0  ;;  %v792_v50 = vmax.f32 %v783_v44, 0.0  ;;  %v906_v44 = vpop.permute.xlu1 %905 }
 0x2dc   : >> { %v800_v53 = vpack.c.bf16 %v791_v49, %v789_v47  ;;  %v801_v54 = vpack.c.bf16 %v792_v50, %v790_v48 }
 0x2de   : >> { %849 = vmatpush.bf16.msra.mxu0 %v800_v53  ;;  %868 = vmatpush.bf16.msra.mxu1 %v801_v54 }
 0x2e2   : >> { %850 = vmatpush.bf16.msra.mxu0 %v798_v57  ;;  %869 = vmatpush.bf16.msra.mxu1 %v799_v58 }
 0x2e5   : >> { %1235 = vmatmul.msk.bf16.vlgmr.msra.gmra.mxu0 %vm548_vm2, %v1272_v59  ;;  %1237 = vmatmul.msk.bf16.vlgmr.msra.gmra.mxu1 %vm548_vm2, %v1272_v59 }
 0x2f5   : >> { %1236 = vmatmul.msk.bf16.gmra.mxu0 %vm548_vm2, %v1273_v60  ;;  %1238 = vmatmul.msk.bf16.gmra.mxu1 %vm548_vm2, %v1273_v60 }
 0x362   : >> { %v852_v61 = vpop.f32.mrf.mxu0  ;;  %v871_v62 = vpop.f32.mrf.mxu1 }
 0x363   : >> { %v853_v15 = vadd.f32 %v852_v61, %v810_v10  ;;  %v872_v16 = vadd.f32 %v871_v62, %v810_v10 }
 0x365   : >> { %v881_v25 = vmax.f32 %v853_v15, 0.0  ;;  %v882_v26 = vmax.f32 %v872_v16, 0.0 }
 0x36a   : >> { %v854_v63 = vpop.f32.mrf.mxu0  ;;  %v873_v0 = vpop.f32.mrf.mxu1 }
 0x36b   : >> { %v855_v11 = vadd.f32 %v854_v63, %v815_v4  ;;  %v874_v12 = vadd.f32 %v873_v0, %v815_v4  ;;  %v985_v63 = vld [vmem:[%s1758_s6] sm:$0x3]  ;;  %v994_v0 = vpop.permute.xlu0 %993 }
 0x36d   : >> { %v883_v21 = vmax.f32 %v855_v11, 0.0  ;;  %v884_v22 = vmax.f32 %v874_v12, 0.0 }
 0x36f   : >> { %v894_v27 = vpack.c.bf16 %v883_v21, %v881_v25  ;;  %v895_v28 = vpack.c.bf16 %v884_v22, %v882_v26 }
 0x372   : >> { %v857_v2 = vpop.f32.mrf.mxu0  ;;  %v876_v3 = vpop.f32.mrf.mxu1 }
 0x373   : >> { %v858_v6 = vadd.f32 %v857_v2, %v820_v1  ;;  %v877_v7 = vadd.f32 %v876_v3, %v820_v1 }
 0x375   : >> { %v885_v17 = vmax.f32 %v858_v6, 0.0  ;;  %v886_v18 = vmax.f32 %v877_v7, 0.0 }
 0x37a   : >> { %v859_v8 = vpop.f32.mrf.mxu0  ;;  %v878_v9 = vpop.f32.mrf.mxu1 }
 0x37b   : >> { %v860_v13 = vadd.f32 %v859_v8, %v825_v5  ;;  %v879_v14 = vadd.f32 %v878_v9, %v825_v5 }
 0x37d   : >> { %v887_v19 = vmax.f32 %v860_v13, 0.0  ;;  %v888_v20 = vmax.f32 %v879_v14, 0.0 }
 0x37f   : >> { %v896_v23 = vpack.c.bf16 %v887_v19, %v885_v17  ;;  %v897_v24 = vpack.c.bf16 %v888_v20, %v886_v18 }
 0x381   : >> { %945 = vmatpush.bf16.msra.mxu2 %v896_v23  ;;  %964 = vmatpush.bf16.msra.mxu3 %v897_v24 }
 0x385   : >> { %946 = vmatpush.bf16.msra.mxu2 %v894_v27  ;;  %965 = vmatpush.bf16.msra.mxu3 %v895_v28 }
 0x388   : >> { %1251 = vmatmul.msk.bf16.vlgmr.msra.gmra.mxu2 %vm548_vm2, %v1274_v29  ;;  %1253 = vmatmul.msk.bf16.vlgmr.msra.gmra.mxu3 %vm548_vm2, %v1274_v29 }
 0x398   : >> { %1252 = vmatmul.msk.bf16.gmra.mxu2 %vm548_vm2, %v1275_v30  ;;  %1254 = vmatmul.msk.bf16.gmra.mxu3 %vm548_vm2, %v1275_v30 }
 0x40b   : >> { %v948_v31 = vpop.f32.mrf.mxu2  ;;  %v967_v32 = vpop.f32.mrf.mxu3 }
 0x40c   : >> { %v949_v49 = vadd.f32 %v948_v31, %v906_v44  ;;  %v968_v50 = vadd.f32 %v967_v32, %v906_v44 }
 0x40e   : >> { %v977_v59 = vmax.f32 %v949_v49, 0.0  ;;  %v978_v60 = vmax.f32 %v968_v50, 0.0 }
 0x413   : >> { %v950_v33 = vpop.f32.mrf.mxu2  ;;  %v969_v34 = vpop.f32.mrf.mxu3 }
 0x414   : >> { %v951_v45 = vadd.f32 %v950_v33, %v911_v39  ;;  %v970_v46 = vadd.f32 %v969_v34, %v911_v39 }
 0x416   : >> { %v979_v55 = vmax.f32 %v951_v45, 0.0  ;;  %v980_v56 = vmax.f32 %v970_v46, 0.0 }
 0x418   : >> { %v986_v61 = vpack.c.bf16 %v979_v55, %v977_v59  ;;  %v987_v62 = vpack.c.bf16 %v980_v56, %v978_v60 }
 0x41b   : >> { %v953_v36 = vpop.f32.mrf.mxu2  ;;  %v972_v37 = vpop.f32.mrf.mxu3 }
 0x41c   : >> { %v954_v40 = vadd.f32 %v953_v36, %v916_v35  ;;  %v973_v41 = vadd.f32 %v972_v37, %v916_v35 }
 0x41e   : >> { %v981_v51 = vmax.f32 %v954_v40, 0.0  ;;  %v982_v52 = vmax.f32 %v973_v41, 0.0 }
 0x423   : >> { %v955_v42 = vpop.f32.mrf.mxu2  ;;  %v974_v43 = vpop.f32.mrf.mxu3 }
 0x424   : >> { %v956_v47 = vadd.f32 %v955_v42, %v921_v38  ;;  %v975_v48 = vadd.f32 %v974_v43, %v921_v38 }
 0x426   : >> { %v983_v53 = vmax.f32 %v956_v47, 0.0  ;;  %v984_v54 = vmax.f32 %v975_v48, 0.0 }
 0x428   : >> { %v988_v57 = vpack.c.bf16 %v983_v53, %v981_v51  ;;  %v989_v58 = vpack.c.bf16 %v984_v54, %v982_v52 }
 0x42a   : >> { %1005 = vmatpush.bf16.msrb.mxu0 %v988_v57  ;;  %1018 = vmatpush.bf16.msrb.mxu1 %v989_v58 }
 0x42e   : >> { %1006 = vmatpush.bf16.msrb.mxu0 %v986_v61  ;;  %1019 = vmatpush.bf16.msrb.mxu1 %v987_v62 }
 0x431   : >> { %1255 = vmatmul.msk.bf16.vlgmr.msrb.gmra.mxu0 %vm548_vm2, %v985_v63  ;;  %1256 = vmatmul.msk.bf16.vlgmr.msrb.gmra.mxu1 %vm548_vm2, %v985_v63 }
 0x4ae   : >> { %v1008_v1 = vpop.f32.mrf.mxu0  ;;  %v1021_v2 = vpop.f32.mrf.mxu1 }
 0x4af   : >> { %v1022_v3 = vadd.f32 %v1021_v2, %v994_v0  ;;  %v1009_v4 = vadd.f32 %v1008_v1, %v994_v0 }
 0x4b1   : >> { %v1027_v5 = vrot.slane %v1022_v3, 4 }
 0x4b2   : > { %384 = sbr.rel (!%p382_p3) target bundleno = 60 (0x3c), region = 141 }
 0x4b3   : >> { %v1029_v6 = vsel %vm1028_vm3, %v1009_v4, %v1027_v5 }
 0x4b4   : >> { %1033 = vst [vmem:[%s1032_s10] sm:$0xff] %v1029_v6 }
 0x4b6   : >> { %v1010_v7 = vpop.f32.mrf.mxu0  ;;  %v1023_v8 = vpop.f32.mrf.mxu1 }
 0x4b7   : > { %1398 = shalt.err (!%p1395_p12)
}
 0x4b8   : > { %1281 = dma.vmem_to_hbm [thread:$0]  (%p1539_p6), %s1049_s20, 256, %s1051_s0, %s1035_s22  }
 0x4b9 PF: > { %s1062_s15 = sand.u32 1, %s1429_s27   ;;  %p1288_p13 = pnand %p1154_p1, %p1545_p10 }
 0x4ba   : > { %s1063_s13 = scalar_lea.sflag [#allocation5], %s1062_s15 }
 0x4bb   : > { %p1289_p0 = pneg %p1288_p13 }
 0x4bd   : > { %1424 = dma.done.wait (%p1289_p0), %s1063_s13, 256  }
 0x4be   : > { %1426 = vsyncadd (%p1289_p0), %s1063_s13, 4294967040  ;;  %p19_p2 = scmp.ge.s32.totalorder %s1521_s11, 4   ;;  %s1771_s27 = smov %s1433_s28 }
 0x4bf   : > { %s1772_s28 = smov %s1437_s29  ;;  %s1773_s29 = smov %s1533_s14 }
 0x4c0   : > { %s1774_s30 = smov %s1521_s11  ;;  %21 = sbr.rel (!%p19_p2) target bundleno = 8 (0x8), region = 152 }
 0x4c5   :  { %1069 = vsyncpa [#allocation4], 1 }
 0x4c6   :  { %1071 = vsyncpa [#allocation4 + $0x1], 1 }
 0x4c7   :  { %1072 = vsyncpa [#allocation5], 1 }
 0x4c8   :  { %1074 = vsyncpa [#allocation5 + $0x1], 1 }

// kernel: tpu_custom_call.1
= control target key start
LH: loop header
LB: loop body
LE: loop exit
PB: predicated region body
PF: predicated region fallthrough
CT: control target
= control target key end

     0   :  { %s1752_s0 = inlined_call_operand.vmem [shape: bf16[4,1024], index: 0, kind: input, shape index: {}]   ;;  %s1753_s1 = inlined_call_operand.vmem [shape: bf16[32,1024], index: 1, kind: input, shape index: {}]   ;;  %s1754_s2 = inlined_call_operand.vmem [shape: bf16[32,4], index: 2, kind: input, shape index: {}]   ;;  %s1755_s3 = inlined_call_operand.vmem [shape: f32[32,1], index: 3, kind: input, shape index: {}]   ;;  %s1756_s4 = inlined_call_operand.hbm [shape: bf16[5,32,32], index: 4, kind: input, shape index: {}]   ;;  %s1757_s5 = inlined_call_operand.vmem [shape: f32[5,32,1], index: 5, kind: input, shape index: {}]   ;;  %s1758_s6 = inlined_call_operand.vmem [shape: bf16[4,32], index: 6, kind: input, shape index: {}]   ;;  %s1759_s7 = inlined_call_operand.vmem [shape: f32[4,1], index: 7, kind: input, shape index: {}]   ;;  %s1760_s8 = inlined_call_operand.hbm [shape: f32[4,1024], index: 8, kind: output, shape index: {}]  }
   0x1   :  { %1761 = sst [smem:[#allocation9_spill]] %s1752_s0 }
   0x2   :  { %1762 = sst [smem:[#allocation10_spill]] %s1753_s1 }
   0x3   :  { %1763 = sst [smem:[#allocation11_spill]] %s1755_s3 }
   0x4   :  { %13 = vsyncpa [#allocation4], 0 }
   0x5   :  { %14 = vsyncpa [#allocation5], 0 }
   0x6   :  { %16 = vsyncpa [#allocation5 + $0x1], 0  ;;  %s1496_s27 = smov 0   ;;  %s1498_s28 = smov 0  }
   0x7   :  { %s1500_s29 = smov 0   ;;  %s1502_s30 = smov 0  }
   0x8 LB: > { %s1517_s9 = sadd.s32 4294967295, %s1441_s30   ;;  %s1151_s10 = sadd.s32 4294967294, %s1441_s30   ;;  %s1441_s30 = sphi %s1502_s30, %s1774_s30   ;;  %s1437_s29 = sphi %s1500_s29, %s1773_s29   ;;  %s1433_s28 = sphi %s1498_s28, %s1772_s28   ;;  %s1429_s27 = sphi %s1496_s27, %s1771_s27  }
   0x9   : > { %s1521_s11 = sadd.s32 1, %s1441_s30   ;;  %s55_s12 = sadd.s32 1, %s1437_s29 }
   0xa   : > { %s52_s13 = ssub.s32 %s1441_s30, %s1521_s11  ;;  %p62_p0 = scmp.ne.s32.totalorder %s1437_s29, %s1433_s28 }
   0xb   : > { %p53_p1 = scmp.eq.s32.totalorder %s52_s13, 0  ;;  %p63_p2 = scmp.eq.s32.totalorder %s1441_s30, 0 }
   0xc   : > { %p218_p3 = scmp.eq.s32.totalorder %s1517_s9, 1  ;;  %p223_p4 = scmp.ne.s32.totalorder %s1433_s28, %s1429_s27 }
   0xd   : > { %s1533_s14 = scalar_select %p53_p1, %s1437_s29, %s55_s12  }
   0xe   : > { %p1535_p5 = por %p63_p2, %p62_p0  ;;  %p1539_p6 = por %p218_p3, %p62_p0 }
   0xf   : > { %p224_p7 = scmp.eq.s32.totalorder %s1151_s10, 1  ;;  %p1152_p8 = scmp.ge.s32.totalorder %s1441_s30, 1 }
  0x10   : > { %p231_p9 = scmp.lt.s32.totalorder %s1441_s30, 3  ;;  %p1291_p11 = scmp.eq.s32.totalorder %s1517_s9, 0 }
  0x11   : > { %p1545_p10 = por %p224_p7, %p223_p4  ;;  %s248_s21 = sshll.u32 %s1756_s4, 4  ;;  %s249_s21 = int_to_ptr.hbm [resolvable:$true] %s248_s21 }
  0x12   : > { %p1550_p12 = pnand %p1152_p8, %p231_p9  ;;  %s1447_s22 = smov [#allocation3]  }
  0x13   : > { %s250_s23 = sshll.u32 %s1447_s22, 4  ;;  %s1448_s24 = smov 64   ;;  %s251_s23 = int_to_ptr.vmem [resolvable:$true] %s250_s23 }
  0x14   : > { %p1283_p13 = pneg %p1550_p12  ;;  %s1449_s25 = smov 4  }
  0x15   : > { %p1154_p1 = scmp.ge.s32.totalorder %s1441_s30, 2 }
  0x16   : > { %p1284_p0 = pnand %p1291_p11, %p1283_p13 }
  0x17   : > { %269 = sbr.rel (%p1154_p1) target bundleno = 46 (0x2e), region = 40 }
  0x18   : > { %1286 = dma.hbm_to_vmem [thread:$0]  (!%p1284_p0), %s249_s21, 1280, %s251_s23, [#allocation4], %s1448_s24, %s1448_s24, %s1449_s25  }
  0x1c   : > { %281 = sbr.rel (!%p1535_p5) target bundleno = 46 (0x2e), region = 48  ;;  %s283_s26 = sand.u32 (%p1535_p5), 1, %s1437_s29  }
  0x1d   : > { %s1263_s10 = sshll.u32 (%p1535_p5), %s1441_s30, 4  ;;  %s1155_s12 = sshll.u32 (%p1535_p5), %s283_s26, 6 }
  0x1e   : > { %s1768_s1 = sld [smem:[#allocation10_spill]] (%p1535_p5)  ;;  %s285_s21 = scalar_lea.vmem (%p1535_p5), [#allocation2], %s1155_s12 }
  0x24   : > { %s288_s20 = scalar_lea.vmem %s1768_s1, %s1263_s10 }
  0x25   : > { %v301_v0 = vld [vmem:[%s288_s20] sm:$0xff]  ;;  %v303_v1 = vld [vmem:[%s288_s20 + $0x8] sm:$0xff] }
  0x26   : > { %v305_v2 = vld [vmem:[%s288_s20 + $0x20] sm:$0xff]  ;;  %302 = vst [vmem:[%s285_s21] sm:$0xff] %v301_v0  ;;  %v307_v3 = vld [vmem:[%s288_s20 + $0x28] sm:$0xff] }
  0x27   : > { %304 = vst [vmem:[%s285_s21 + $0x8] sm:$0xff] %v303_v1  ;;  %v309_v4 = vld [vmem:[%s288_s20 + $0x40] sm:$0xff]  ;;  %v311_v5 = vld [vmem:[%s288_s20 + $0x48] sm:$0xff] }
  0x28   : > { %306 = vst [vmem:[%s285_s21 + $0x10] sm:$0xff] %v305_v2  ;;  %v313_v6 = vld [vmem:[%s288_s20 + $0x60] sm:$0xff]  ;;  %v315_v7 = vld [vmem:[%s288_s20 + $0x68] sm:$0xff] }
  0x29   : > { %308 = vst [vmem:[%s285_s21 + $0x18] sm:$0xff] %v307_v3 }
  0x2a   : > { %310 = vst [vmem:[%s285_s21 + $0x20] sm:$0xff] %v309_v4 }
  0x2b   : > { %312 = vst [vmem:[%s285_s21 + $0x28] sm:$0xff] %v311_v5 }
  0x2c   : > { %314 = vst [vmem:[%s285_s21 + $0x30] sm:$0xff] %v313_v6 }
  0x2d   : > { %316 = vst [vmem:[%s285_s21 + $0x38] sm:$0xff] %v315_v7 }
  0x2e PF: > { %325 = sbr.rel (%p1550_p12) target bundleno = 1209 (0x4b9), region = 71  ;;  %s1574_s15 = sand.u32 (!%p1550_p12), 1, %s1433_s28  }
  0x2f   : > { %s1159_s22 = sshll.u32 (!%p1550_p12), %s1574_s15, 6 }
  0x30   : > { %s1577_s23 = scalar_lea.vmem (!%p1550_p12), [#allocation2], %s1159_s22 }
  0x33   : > { %1420 = dma.done.wait (%p1291_p11), [#allocation4], 1280  }
  0x34   : > { %1422 = vsyncadd (%p1291_p11), [#allocation4], 4294966016  ;;  %s1161_s24 = sshll.u32 %s1574_s15, 4  ;;  %s1162_s25 = sshll.u32 %s1517_s9, 2 }
  0x35   : > { %p372_p2 = scmp.lt.s32.totalorder %s1162_s25, 7  ;;  %s1769_s0 = sld [smem:[#allocation9_spill]] }
  0x36   : > { %s1590_s13 = scalar_lea.vmem [#allocation6], %s1161_s24  ;;  %s1592_s19 = smov 0  }
  0x37   : > { %s1776_s25 = smov (!%p372_p2, %s1162_s25), 7 }
  0x38   : > { %s1163_s18 = sshll.u32 %s1776_s25, 1 }
  0x3b   : > { %s1588_s12 = scalar_lea.vmem %s1769_s0, %s1163_s18 }
  0x3c LB: >> { %s1770_s3 = sld [smem:[#allocation11_spill]]  ;;  %v1450_v10 = vmov 0   ;;  %s1164_s24 = sshll.u32 %s1445_s19, 8  ;;  %vm447_vm0 = vcmask 1041408   ;;  %v514_v18 = vld [vmem:[%s1757_s5] sm:$0xff]  ;;  %v515_v19 = vld [vmem:[%s1757_s5 + $0x8] sm:$0xff]  ;;  %s1445_s19 = sphi %s1592_s19, %s385_s19  }
  0x3d   : >> { %1339 = vset.pattern.permute.xlu1 %v1450_v10  ;;  %1338 = vset.pattern.permute.xlu0 %v1450_v10  ;;  %s1604_s18 = sshra.s32 %s1164_s24, 7  ;;  %v1264_v20 = vld [vmem:[%s1754_s2] sm:$0xff]  ;;  %vm440_vm1 = vcmask 31744   ;;  %v1194_v21 = vld [vmem:[%s1757_s5 + $0x38] sm:$0xff]  ;;  %v1209_v23 = vld [vmem:[%s1757_s5 + $0x50] sm:$0xff]  ;;  %vm548_vm2 = vcmask 261120  }
  0x3e   : >> { %1340 = vset.pattern.permute.xlu2 %v1450_v10  ;;  %s1165_s26 = sshll.u32 %s1604_s18, 1  ;;  %v1191_v22 = vld [vmem:[%s1757_s5 + $0x20] sm:$0xff]  ;;  %v1210_v24 = vld [vmem:[%s1757_s5 + $0x58] sm:$0xff]  ;;  %v1265_v25 = vld [vmem:[%s1754_s2 + $0x8] sm:$0xff]  ;;  %s1166_s20 = sshll.u32 %s1604_s18, 2  ;;  %vm1028_vm3 = vcmask 1043456  }
  0x3f   : >> { %s390_s10 = scalar_lea.vmem %s1588_s12, %s1165_s26  ;;  %v1208_v26 = vld [vmem:[%s1757_s5 + $0x48] sm:$0xff]  ;;  %v1225_v27 = vld [vmem:[%s1757_s5 + $0x70] sm:$0xff]  ;;  %v1223_v28 = vld [vmem:[%s1757_s5 + $0x60] sm:$0xff]  ;;  %s393_s21 = scalar_lea.vmem %s1577_s23, %s1166_s20 [#allocation2] }
  0x40   : >> { %v391_v11 = vld [vmem:[%s390_s10] sm:$0xf]  ;;  %v1224_v29 = vld [vmem:[%s1757_s5 + $0x68] sm:$0xff]  ;;  %v1242_v30 = vld [vmem:[%s1757_s5 + $0x98] sm:$0xff]  ;;  %s1032_s10 = scalar_lea.vmem %s1590_s13, %s1166_s20 [#allocation6]  ;;  %s385_s19 = sadd.s32 1, %s1445_s19  }
  0x41   : >> { %437 = vst [vmem:[#allocation1] ss:$4 sm:$0xff] %v391_v11  ;;  %v1239_v31 = vld [vmem:[%s1757_s5 + $0x80] sm:$0xff]  ;;  %v516_v35 = vld [vmem:[%s1757_s5 + $0x10] sm:$0xff]  ;;  %v517_v38 = vld [vmem:[%s1757_s5 + $0x18] sm:$0xff]  ;;  %p382_p3 = scmp.ge.s32.totalorder %s385_s19, 2  }
  0x42   : >> { %v404_v8 = vld [vmem:[%s1770_s3 + $0x10] sm:$0xff]  ;;  %v402_v9 = vld [vmem:[%s1770_s3] sm:$0xff]  ;;  %v405_v12 = vld [vmem:[%s1770_s3 + $0x18] sm:$0xff]  ;;  %530 = vperm.xlu2 %1340, %v516_v35   ;;  %s1276_s1 = sshll.u32 (%p382_p3), %s1517_s9, 4  ;;  %s1048_s20 = sshll.u32 (%p382_p3), %s1590_s13, 4  ;;  %s1049_s20 = int_to_ptr.vmem [resolvable:$true] %s1048_s20 }
  0x43   : >> { %418 = vperm.xlu0 %1338, %v404_v8   ;;  %408 = vperm.xlu1 %1339, %v402_v9   ;;  %v403_v13 = vld [vmem:[%s1770_s3 + $0x8] sm:$0xff]  ;;  %v990_v32 = vld [vmem:[%s1759_s7] sm:$0xf]  ;;  %v397_v44 = vld [vmem:[%s393_s21 + $0x30] sm:$0xff]  ;;  %s1046_s18 = scalar_lea.hbm (%p382_p3), %s1760_s8, %s1276_s1  ;;  %s1035_s22 = scalar_lea.sflag (%p382_p3), [#allocation5], %s1574_s15 }
  0x44   : >> { %v396_v43 = vld [vmem:[%s393_s21 + $0x20] sm:$0xff]  ;;  %v395_v45 = vld [vmem:[%s393_s21 + $0x10] sm:$0xff]  ;;  %v496_v54 = vunpack.c.l.bf16 %v397_v44  ;;  %v497_v55 = vunpack.c.h.bf16 %v397_v44  ;;  %s1050_s0 = sshll.u32 (%p382_p3), %s1046_s18, 4  ;;  %s1391_s9 = scalar_lea.hbm (%p382_p3), %s1760_s8, 32  ;;  %s1051_s0 = int_to_ptr.hbm [resolvable:$true] %s1050_s0 }
  0x45   : >> { %v494_v46 = vunpack.c.l.bf16 %v396_v43  ;;  %v495_v47 = vunpack.c.h.bf16 %v396_v43  ;;  %v1193_v48 = vld [vmem:[%s1757_s5 + $0x30] sm:$0xff]  ;;  %v394_v51 = vld [vmem:[%s393_s21] sm:$0xff]  ;;  %v492_v56 = vunpack.c.l.bf16 %v395_v45  ;;  %v493_v57 = vunpack.c.h.bf16 %v395_v45  ;;  %s1385_s25 = sshra.s32 (%p382_p3), %s1051_s0, 4  ;;  %s1386_s25 = int_to_ptr.hbm [resolvable:$true] %s1385_s25 }
  0x46   : >> { %v490_v1 = vunpack.c.l.bf16 %v394_v51  ;;  %v491_v3 = vunpack.c.h.bf16 %v394_v51  ;;  %s1387_s24 = scalar_lea.hbm (%p382_p3), %s1386_s25, 16  ;;  %p1392_p8 = scmp.lt.s32.totalorder (%p382_p3), %s1386_s25, %s1760_s8 }
  0x47   : > { %p1388_p4 = scmp.ne.s32.totalorder (%p382_p3), %s1386_s25, %s1387_s24  ;;  %p1393_p9 = scmp.lt.s32.totalorder (%p382_p3), %s1391_s9, %s1387_s24 }
  0x48   : >> { %v438_v14 = vld.sshfl [vmem:[#allocation1] sm:$0xff pattern:$0x73625140]  ;;  %v439_v15 = vld.sshfl [vmem:[#allocation1 + $0x8] sm:$0xff pattern:$0x73625140] }
  0x49   : >> { %v448_v16 = vsel %vm447_vm0, %v438_v14, 0  ;;  %v450_v17 = vsel %vm447_vm0, %v439_v15, 0  ;;  %p1389_p5 = pnand (%p382_p3), %p1388_p4, %p1539_p6  ;;  %p1394_p11 = por (%p382_p3), %p1393_p9, %p1392_p8 }
  0x4a   : >> { %459 = vmatpush.bf16.msra.mxu0 %v448_v16  ;;  %478 = vmatpush.bf16.msra.mxu1 %v450_v17  ;;  %v1266_v17 = vld [vmem:[#allocation3] sm:$0xff] }
  0x4b   : >> { %423 = vperm.xlu0 %1338, %v405_v12   ;;  %413 = vperm.xlu1 %1339, %v403_v13   ;;  %v1192_v12 = vld [vmem:[%s1757_s5 + $0x28] sm:$0xff]  ;;  %p1390_p7 = pneg (%p382_p3), %p1389_p5 }
  0x4c   : >> { %535 = vperm.xlu2 %1340, %v517_v38  }
  0x4d   : >> { %1175 = vmatmul.msk.bf16.vlgmr.msra.gmra.mxu0 %vm440_vm1, %v1264_v20  ;;  %1177 = vmatmul.msk.bf16.vlgmr.msra.gmra.mxu1 %vm440_vm1, %v1264_v20  ;;  %v1267_v20 = vld [vmem:[#allocation3 + $0x8] sm:$0xff]  ;;  %p1395_p12 = pnand (%p382_p3), %p1394_p11, %p1390_p7 }
  0x53   : >> { %520 = vperm.xlu0 %1338, %v514_v18   ;;  %525 = vperm.xlu1 %1339, %v515_v19   ;;  %v1207_v18 = vld [vmem:[%s1757_s5 + $0x40] sm:$0xff]  ;;  %v1226_v19 = vld [vmem:[%s1757_s5 + $0x78] sm:$0xff] }
  0x54   : >> { %627 = vperm.xlu2 %1340, %v1193_v48  }
  0x5b   : >> { %632 = vperm.xlu0 %1338, %v1194_v21   ;;  %617 = vperm.xlu1 %1339, %v1191_v22   ;;  %v1241_v21 = vld [vmem:[%s1757_s5 + $0x90] sm:$0xff]  ;;  %v1240_v22 = vld [vmem:[%s1757_s5 + $0x88] sm:$0xff] }
  0x5c   : >> { %622 = vperm.xlu2 %1340, %v1192_v12  }
  0x5d   : >> { %1176 = vmatmul.msk.bf16.gmra.mxu0 %vm440_vm1, %v1265_v25  ;;  %1178 = vmatmul.msk.bf16.gmra.mxu1 %vm440_vm1, %v1265_v25 }
  0x63   : >> { %723 = vperm.xlu0 %1338, %v1209_v23   ;;  %728 = vperm.xlu1 %1339, %v1210_v24  }
  0x64   : >> { %713 = vperm.xlu2 %1340, %v1207_v18  }
  0x6b   : >> { %718 = vperm.xlu0 %1338, %v1208_v26   ;;  %819 = vperm.xlu1 %1339, %v1225_v27  }
  0x6c   : >> { %824 = vperm.xlu2 %1340, %v1226_v19  }
  0x73   : >> { %809 = vperm.xlu0 %1338, %v1223_v28   ;;  %814 = vperm.xlu1 %1339, %v1224_v29  }
  0x74   : >> { %915 = vperm.xlu2 %1340, %v1241_v21  }
  0x7b   : >> { %920 = vperm.xlu0 %1338, %v1242_v30   ;;  %905 = vperm.xlu1 %1339, %v1239_v31  }
  0x7c   : >> { %910 = vperm.xlu2 %1340, %v1240_v22  }
  0x83   : >> { %993 = vperm.xlu0 %1338, %v990_v32  }
  0x9c   : >> { %v531_v27 = vpop.permute.xlu2 %530 }
  0xa6   : >> { %v536_v31 = vpop.permute.xlu2 %535 }
  0xb5   : >> { %v419_v39 = vpop.permute.xlu0 %418  ;;  %v409_v40 = vpop.permute.xlu1 %408 }
  0xbd   : >> { %v424_v49 = vpop.permute.xlu0 %423  ;;  %v414_v50 = vpop.permute.xlu1 %413 }
  0xc5   : >> { %v526_v30 = vpop.permute.xlu1 %525 }
  0xca   : >> { %v461_v33 = vpop.f32.mrf.mxu0  ;;  %v480_v34 = vpop.f32.mrf.mxu1 }
  0xcb   : >> { %v462_v0 = vadd.f32 %v461_v33, %v409_v40  ;;  %v481_v2 = vadd.f32 %v480_v34, %v409_v40 }
  0xcd   : >> { %v498_v13 = vadd.f32 %v490_v1, %v462_v0  ;;  %v499_v14 = vadd.f32 %v491_v3, %v481_v2 }
  0xd2   : >> { %v463_v36 = vpop.f32.mrf.mxu0  ;;  %v482_v37 = vpop.f32.mrf.mxu1 }
  0xd3   : >> { %v464_v60 = vadd.f32 %v463_v36, %v414_v50  ;;  %v483_v61 = vadd.f32 %v482_v37, %v414_v50  ;;  %v521_v36 = vpop.permute.xlu0 %520 }
  0xd5   : >> { %v500_v8 = vadd.f32 %v492_v56, %v464_v60  ;;  %v501_v9 = vadd.f32 %v493_v57, %v483_v61  ;;  %v1269_v56 = vld [vmem:[#allocation3 + $0x18] sm:$0xff]  ;;  %v628_v61 = vpop.permute.xlu2 %627 }
  0xd7   : >> { %v510_v15 = vpack.c.bf16 %v500_v8, %v498_v13  ;;  %v511_v16 = vpack.c.bf16 %v501_v9, %v499_v14 }
  0xda   : >> { %v466_v41 = vpop.f32.mrf.mxu0  ;;  %v485_v42 = vpop.f32.mrf.mxu1 }
  0xdb   : >> { %v467_v52 = vadd.f32 %v466_v41, %v419_v39  ;;  %v486_v53 = vadd.f32 %v485_v42, %v419_v39  ;;  %v633_v0 = vpop.permute.xlu0 %632 }
  0xdd   : >> { %v502_v4 = vadd.f32 %v494_v46, %v467_v52  ;;  %v503_v6 = vadd.f32 %v495_v47, %v486_v53  ;;  %v623_v1 = vpop.permute.xlu2 %622 }
  0xe2   : >> { %v468_v58 = vpop.f32.mrf.mxu0  ;;  %v487_v59 = vpop.f32.mrf.mxu1 }
  0xe3   : >> { %v469_v62 = vadd.f32 %v468_v58, %v424_v49  ;;  %v488_v63 = vadd.f32 %v487_v59, %v424_v49 }
  0xe5   : >> { %v504_v5 = vadd.f32 %v496_v54, %v469_v62  ;;  %v505_v7 = vadd.f32 %v497_v55, %v488_v63  ;;  %v1268_v55 = vld [vmem:[#allocation3 + $0x10] sm:$0xff] }
  0xe7   : >> { %v512_v10 = vpack.c.bf16 %v504_v5, %v502_v4  ;;  %v513_v11 = vpack.c.bf16 %v505_v7, %v503_v6  ;;  %v618_v6 = vpop.permute.xlu1 %617 }
  0xe9   : >> { %561 = vmatpush.bf16.msra.mxu2 %v512_v10  ;;  %580 = vmatpush.bf16.msra.mxu3 %v513_v11 }
  0xed   : >> { %562 = vmatpush.bf16.msra.mxu2 %v510_v15  ;;  %581 = vmatpush.bf16.msra.mxu3 %v511_v16 }
  0xf0   : >> { %1187 = vmatmul.msk.bf16.vlgmr.msra.gmra.mxu2 %vm548_vm2, %v1266_v17  ;;  %1189 = vmatmul.msk.bf16.vlgmr.msra.gmra.mxu3 %vm548_vm2, %v1266_v17 }
 0x100   : >> { %1188 = vmatmul.msk.bf16.gmra.mxu2 %vm548_vm2, %v1267_v20  ;;  %1190 = vmatmul.msk.bf16.gmra.mxu3 %vm548_vm2, %v1267_v20 }
 0x173   : >> { %v564_v23 = vpop.f32.mrf.mxu2  ;;  %v583_v24 = vpop.f32.mrf.mxu3 }
 0x174   : >> { %v565_v41 = vadd.f32 %v564_v23, %v521_v36  ;;  %v584_v42 = vadd.f32 %v583_v24, %v521_v36 }
 0x176   : >> { %v593_v51 = vmax.f32 %v565_v41, 0.0  ;;  %v594_v52 = vmax.f32 %v584_v42, 0.0 }
 0x17b   : >> { %v566_v25 = vpop.f32.mrf.mxu2  ;;  %v585_v26 = vpop.f32.mrf.mxu3 }
 0x17c   : >> { %v567_v37 = vadd.f32 %v566_v25, %v526_v30  ;;  %v586_v38 = vadd.f32 %v585_v26, %v526_v30  ;;  %v1270_v25 = vld [vmem:[#allocation3 + $0x20] sm:$0xff]  ;;  %v1271_v26 = vld [vmem:[#allocation3 + $0x28] sm:$0xff] }
 0x17e   : >> { %v595_v47 = vmax.f32 %v567_v37, 0.0  ;;  %v596_v48 = vmax.f32 %v586_v38, 0.0 }
 0x180   : >> { %v606_v53 = vpack.c.bf16 %v595_v47, %v593_v51  ;;  %v607_v54 = vpack.c.bf16 %v596_v48, %v594_v52 }
 0x183   : >> { %v569_v28 = vpop.f32.mrf.mxu2  ;;  %v588_v29 = vpop.f32.mrf.mxu3 }
 0x184   : >> { %v570_v32 = vadd.f32 %v569_v28, %v531_v27  ;;  %v589_v33 = vadd.f32 %v588_v29, %v531_v27 }
 0x186   : >> { %v597_v43 = vmax.f32 %v570_v32, 0.0  ;;  %v598_v44 = vmax.f32 %v589_v33, 0.0 }
 0x18b   : >> { %v571_v34 = vpop.f32.mrf.mxu2  ;;  %v590_v35 = vpop.f32.mrf.mxu3 }
 0x18c   : >> { %v572_v39 = vadd.f32 %v571_v34, %v536_v31  ;;  %v591_v40 = vadd.f32 %v590_v35, %v536_v31  ;;  %v724_v31 = vpop.permute.xlu0 %723  ;;  %v729_v34 = vpop.permute.xlu1 %728 }
 0x18e   : >> { %v599_v45 = vmax.f32 %v572_v39, 0.0  ;;  %v600_v46 = vmax.f32 %v591_v40, 0.0  ;;  %v714_v40 = vpop.permute.xlu2 %713 }
 0x190   : >> { %v608_v49 = vpack.c.bf16 %v599_v45, %v597_v43  ;;  %v609_v50 = vpack.c.bf16 %v600_v46, %v598_v44 }
 0x192   : >> { %657 = vmatpush.bf16.msrb.mxu0 %v608_v49  ;;  %676 = vmatpush.bf16.msrb.mxu1 %v609_v50 }
 0x194   : >> { %v719_v35 = vpop.permute.xlu0 %718 }
 0x196   : >> { %658 = vmatpush.bf16.msrb.mxu0 %v606_v53  ;;  %677 = vmatpush.bf16.msrb.mxu1 %v607_v54 }
 0x199   : >> { %1203 = vmatmul.msk.bf16.vlgmr.msrb.gmra.mxu0 %vm548_vm2, %v1268_v55  ;;  %1205 = vmatmul.msk.bf16.vlgmr.msrb.gmra.mxu1 %vm548_vm2, %v1268_v55 }
 0x1a9   : >> { %1204 = vmatmul.msk.bf16.gmra.mxu0 %vm548_vm2, %v1269_v56  ;;  %1206 = vmatmul.msk.bf16.gmra.mxu1 %vm548_vm2, %v1269_v56 }
 0x216   : >> { %v660_v57 = vpop.f32.mrf.mxu0  ;;  %v679_v58 = vpop.f32.mrf.mxu1 }
 0x217   : >> { %v661_v11 = vadd.f32 %v660_v57, %v618_v6  ;;  %v680_v12 = vadd.f32 %v679_v58, %v618_v6 }
 0x219   : >> { %v689_v21 = vmax.f32 %v661_v11, 0.0  ;;  %v690_v22 = vmax.f32 %v680_v12, 0.0 }
 0x21e   : >> { %v662_v59 = vpop.f32.mrf.mxu0  ;;  %v681_v60 = vpop.f32.mrf.mxu1 }
 0x21f   : >> { %v663_v7 = vadd.f32 %v662_v59, %v623_v1  ;;  %v682_v8 = vadd.f32 %v681_v60, %v623_v1  ;;  %v1272_v59 = vld [vmem:[#allocation3 + $0x30] sm:$0xff]  ;;  %v1273_v60 = vld [vmem:[#allocation3 + $0x38] sm:$0xff]  ;;  %v820_v1 = vpop.permute.xlu1 %819 }
 0x221   : >> { %v691_v17 = vmax.f32 %v663_v7, 0.0  ;;  %v692_v18 = vmax.f32 %v682_v8, 0.0 }
 0x223   : >> { %v702_v23 = vpack.c.bf16 %v691_v17, %v689_v21  ;;  %v703_v24 = vpack.c.bf16 %v692_v18, %v690_v22 }
 0x226   : >> { %v665_v62 = vpop.f32.mrf.mxu0  ;;  %v684_v63 = vpop.f32.mrf.mxu1 }
 0x227   : >> { %v666_v2 = vadd.f32 %v665_v62, %v628_v61  ;;  %v685_v3 = vadd.f32 %v684_v63, %v628_v61 }
 0x229   : >> { %v693_v13 = vmax.f32 %v666_v2, 0.0  ;;  %v694_v14 = vmax.f32 %v685_v3, 0.0 }
 0x22e   : >> { %v667_v4 = vpop.f32.mrf.mxu0  ;;  %v686_v5 = vpop.f32.mrf.mxu1 }
 0x22f   : >> { %v668_v9 = vadd.f32 %v667_v4, %v633_v0  ;;  %v687_v10 = vadd.f32 %v686_v5, %v633_v0  ;;  %v815_v4 = vpop.permute.xlu1 %814  ;;  %v825_v5 = vpop.permute.xlu2 %824 }
 0x231   : >> { %v695_v15 = vmax.f32 %v668_v9, 0.0  ;;  %v696_v16 = vmax.f32 %v687_v10, 0.0  ;;  %v810_v10 = vpop.permute.xlu0 %809 }
 0x233   : >> { %v704_v19 = vpack.c.bf16 %v695_v15, %v693_v13  ;;  %v705_v20 = vpack.c.bf16 %v696_v16, %v694_v14 }
 0x235   : >> { %753 = vmatpush.bf16.msrb.mxu2 %v704_v19  ;;  %772 = vmatpush.bf16.msrb.mxu3 %v705_v20 }
 0x239   : >> { %754 = vmatpush.bf16.msrb.mxu2 %v702_v23  ;;  %773 = vmatpush.bf16.msrb.mxu3 %v703_v24 }
 0x23c   : >> { %1219 = vmatmul.msk.bf16.vlgmr.msrb.gmra.mxu2 %vm548_vm2, %v1270_v25  ;;  %1221 = vmatmul.msk.bf16.vlgmr.msrb.gmra.mxu3 %vm548_vm2, %v1270_v25 }
 0x24c   : >> { %1220 = vmatmul.msk.bf16.gmra.mxu2 %vm548_vm2, %v1271_v26  ;;  %1222 = vmatmul.msk.bf16.gmra.mxu3 %vm548_vm2, %v1271_v26 }
 0x2bf   : >> { %v756_v27 = vpop.f32.mrf.mxu2  ;;  %v775_v28 = vpop.f32.mrf.mxu3 }
 0x2c0   : >> { %v757_v45 = vadd.f32 %v756_v27, %v714_v40  ;;  %v776_v46 = vadd.f32 %v775_v28, %v714_v40 }
 0x2c2   : >> { %v785_v55 = vmax.f32 %v757_v45, 0.0  ;;  %v786_v56 = vmax.f32 %v776_v46, 0.0 }
 0x2c7   : >> { %v758_v29 = vpop.f32.mrf.mxu2  ;;  %v777_v30 = vpop.f32.mrf.mxu3 }
 0x2c8   : >> { %v759_v41 = vadd.f32 %v758_v29, %v719_v35  ;;  %v778_v42 = vadd.f32 %v777_v30, %v719_v35  ;;  %v1274_v29 = vld [vmem:[#allocation3 + $0x40] sm:$0xff]  ;;  %v1275_v30 = vld [vmem:[#allocation3 + $0x48] sm:$0xff]  ;;  %v916_v35 = vpop.permute.xlu2 %915 }
 0x2ca   : >> { %v787_v51 = vmax.f32 %v759_v41, 0.0  ;;  %v788_v52 = vmax.f32 %v778_v42, 0.0 }
 0x2cc   : >> { %v798_v57 = vpack.c.bf16 %v787_v51, %v785_v55  ;;  %v799_v58 = vpack.c.bf16 %v788_v52, %v786_v56 }
 0x2cf   : >> { %v761_v32 = vpop.f32.mrf.mxu2  ;;  %v780_v33 = vpop.f32.mrf.mxu3 }
 0x2d0   : >> { %v762_v36 = vadd.f32 %v761_v32, %v724_v31  ;;  %v781_v37 = vadd.f32 %v780_v33, %v724_v31 }
 0x2d2   : >> { %v789_v47 = vmax.f32 %v762_v36, 0.0  ;;  %v790_v48 = vmax.f32 %v781_v37, 0.0 }
 0x2d7   : >> { %v763_v38 = vpop.f32.mrf.mxu2  ;;  %v782_v39 = vpop.f32.mrf.mxu3 }
 0x2d8   : >> { %v764_v43 = vadd.f32 %v763_v38, %v729_v34  ;;  %v783_v44 = vadd.f32 %v782_v39, %v729_v34  ;;  %v921_v38 = vpop.permute.xlu0 %920  ;;  %v911_v39 = vpop.permute.xlu2 %910 }
 0x2da   : >> { %v791_v49 = vmax.f32 %v764_v43, 0.0  ;;  %v792_v50 = vmax.f32 %v783_v44, 0.0  ;;  %v906_v44 = vpop.permute.xlu1 %905 }
 0x2dc   : >> { %v800_v53 = vpack.c.bf16 %v791_v49, %v789_v47  ;;  %v801_v54 = vpack.c.bf16 %v792_v50, %v790_v48 }
 0x2de   : >> { %849 = vmatpush.bf16.msra.mxu0 %v800_v53  ;;  %868 = vmatpush.bf16.msra.mxu1 %v801_v54 }
 0x2e2   : >> { %850 = vmatpush.bf16.msra.mxu0 %v798_v57  ;;  %869 = vmatpush.bf16.msra.mxu1 %v799_v58 }
 0x2e5   : >> { %1235 = vmatmul.msk.bf16.vlgmr.msra.gmra.mxu0 %vm548_vm2, %v1272_v59  ;;  %1237 = vmatmul.msk.bf16.vlgmr.msra.gmra.mxu1 %vm548_vm2, %v1272_v59 }
 0x2f5   : >> { %1236 = vmatmul.msk.bf16.gmra.mxu0 %vm548_vm2, %v1273_v60  ;;  %1238 = vmatmul.msk.bf16.gmra.mxu1 %vm548_vm2, %v1273_v60 }
 0x362   : >> { %v852_v61 = vpop.f32.mrf.mxu0  ;;  %v871_v62 = vpop.f32.mrf.mxu1 }
 0x363   : >> { %v853_v15 = vadd.f32 %v852_v61, %v810_v10  ;;  %v872_v16 = vadd.f32 %v871_v62, %v810_v10 }
 0x365   : >> { %v881_v25 = vmax.f32 %v853_v15, 0.0  ;;  %v882_v26 = vmax.f32 %v872_v16, 0.0 }
 0x36a   : >> { %v854_v63 = vpop.f32.mrf.mxu0  ;;  %v873_v0 = vpop.f32.mrf.mxu1 }
 0x36b   : >> { %v855_v11 = vadd.f32 %v854_v63, %v815_v4  ;;  %v874_v12 = vadd.f32 %v873_v0, %v815_v4  ;;  %v985_v63 = vld [vmem:[%s1758_s6] sm:$0x3]  ;;  %v994_v0 = vpop.permute.xlu0 %993 }
 0x36d   : >> { %v883_v21 = vmax.f32 %v855_v11, 0.0  ;;  %v884_v22 = vmax.f32 %v874_v12, 0.0 }
 0x36f   : >> { %v894_v27 = vpack.c.bf16 %v883_v21, %v881_v25  ;;  %v895_v28 = vpack.c.bf16 %v884_v22, %v882_v26 }
 0x372   : >> { %v857_v2 = vpop.f32.mrf.mxu0  ;;  %v876_v3 = vpop.f32.mrf.mxu1 }
 0x373   : >> { %v858_v6 = vadd.f32 %v857_v2, %v820_v1  ;;  %v877_v7 = vadd.f32 %v876_v3, %v820_v1 }
 0x375   : >> { %v885_v17 = vmax.f32 %v858_v6, 0.0  ;;  %v886_v18 = vmax.f32 %v877_v7, 0.0 }
 0x37a   : >> { %v859_v8 = vpop.f32.mrf.mxu0  ;;  %v878_v9 = vpop.f32.mrf.mxu1 }
 0x37b   : >> { %v860_v13 = vadd.f32 %v859_v8, %v825_v5  ;;  %v879_v14 = vadd.f32 %v878_v9, %v825_v5 }
 0x37d   : >> { %v887_v19 = vmax.f32 %v860_v13, 0.0  ;;  %v888_v20 = vmax.f32 %v879_v14, 0.0 }
 0x37f   : >> { %v896_v23 = vpack.c.bf16 %v887_v19, %v885_v17  ;;  %v897_v24 = vpack.c.bf16 %v888_v20, %v886_v18 }
 0x381   : >> { %945 = vmatpush.bf16.msra.mxu2 %v896_v23  ;;  %964 = vmatpush.bf16.msra.mxu3 %v897_v24 }
 0x385   : >> { %946 = vmatpush.bf16.msra.mxu2 %v894_v27  ;;  %965 = vmatpush.bf16.msra.mxu3 %v895_v28 }
 0x388   : >> { %1251 = vmatmul.msk.bf16.vlgmr.msra.gmra.mxu2 %vm548_vm2, %v1274_v29  ;;  %1253 = vmatmul.msk.bf16.vlgmr.msra.gmra.mxu3 %vm548_vm2, %v1274_v29 }
 0x398   : >> { %1252 = vmatmul.msk.bf16.gmra.mxu2 %vm548_vm2, %v1275_v30  ;;  %1254 = vmatmul.msk.bf16.gmra.mxu3 %vm548_vm2, %v1275_v30 }
 0x40b   : >> { %v948_v31 = vpop.f32.mrf.mxu2  ;;  %v967_v32 = vpop.f32.mrf.mxu3 }
 0x40c   : >> { %v949_v49 = vadd.f32 %v948_v31, %v906_v44  ;;  %v968_v50 = vadd.f32 %v967_v32, %v906_v44 }
 0x40e   : >> { %v977_v59 = vmax.f32 %v949_v49, 0.0  ;;  %v978_v60 = vmax.f32 %v968_v50, 0.0 }
 0x413   : >> { %v950_v33 = vpop.f32.mrf.mxu2  ;;  %v969_v34 = vpop.f32.mrf.mxu3 }
 0x414   : >> { %v951_v45 = vadd.f32 %v950_v33, %v911_v39  ;;  %v970_v46 = vadd.f32 %v969_v34, %v911_v39 }
 0x416   : >> { %v979_v55 = vmax.f32 %v951_v45, 0.0  ;;  %v980_v56 = vmax.f32 %v970_v46, 0.0 }
 0x418   : >> { %v986_v61 = vpack.c.bf16 %v979_v55, %v977_v59  ;;  %v987_v62 = vpack.c.bf16 %v980_v56, %v978_v60 }
 0x41b   : >> { %v953_v36 = vpop.f32.mrf.mxu2  ;;  %v972_v37 = vpop.f32.mrf.mxu3 }
 0x41c   : >> { %v954_v40 = vadd.f32 %v953_v36, %v916_v35  ;;  %v973_v41 = vadd.f32 %v972_v37, %v916_v35 }
 0x41e   : >> { %v981_v51 = vmax.f32 %v954_v40, 0.0  ;;  %v982_v52 = vmax.f32 %v973_v41, 0.0 }
 0x423   : >> { %v955_v42 = vpop.f32.mrf.mxu2  ;;  %v974_v43 = vpop.f32.mrf.mxu3 }
 0x424   : >> { %v956_v47 = vadd.f32 %v955_v42, %v921_v38  ;;  %v975_v48 = vadd.f32 %v974_v43, %v921_v38 }
 0x426   : >> { %v983_v53 = vmax.f32 %v956_v47, 0.0  ;;  %v984_v54 = vmax.f32 %v975_v48, 0.0 }
 0x428   : >> { %v988_v57 = vpack.c.bf16 %v983_v53, %v981_v51  ;;  %v989_v58 = vpack.c.bf16 %v984_v54, %v982_v52 }
 0x42a   : >> { %1005 = vmatpush.bf16.msrb.mxu0 %v988_v57  ;;  %1018 = vmatpush.bf16.msrb.mxu1 %v989_v58 }
 0x42e   : >> { %1006 = vmatpush.bf16.msrb.mxu0 %v986_v61  ;;  %1019 = vmatpush.bf16.msrb.mxu1 %v987_v62 }
 0x431   : >> { %1255 = vmatmul.msk.bf16.vlgmr.msrb.gmra.mxu0 %vm548_vm2, %v985_v63  ;;  %1256 = vmatmul.msk.bf16.vlgmr.msrb.gmra.mxu1 %vm548_vm2, %v985_v63 }
 0x4ae   : >> { %v1008_v1 = vpop.f32.mrf.mxu0  ;;  %v1021_v2 = vpop.f32.mrf.mxu1 }
 0x4af   : >> { %v1022_v3 = vadd.f32 %v1021_v2, %v994_v0  ;;  %v1009_v4 = vadd.f32 %v1008_v1, %v994_v0 }
 0x4b1   : >> { %v1027_v5 = vrot.slane %v1022_v3, 4 }
 0x4b2   : > { %384 = sbr.rel (!%p382_p3) target bundleno = 60 (0x3c), region = 141 }
 0x4b3   : >> { %v1029_v6 = vsel %vm1028_vm3, %v1009_v4, %v1027_v5 }
 0x4b4   : >> { %1033 = vst [vmem:[%s1032_s10] sm:$0xff] %v1029_v6 }
 0x4b6   : >> { %v1010_v7 = vpop.f32.mrf.mxu0  ;;  %v1023_v8 = vpop.f32.mrf.mxu1 }
 0x4b7   : > { %1398 = shalt.err (!%p1395_p12)
}
 0x4b8   : > { %1281 = dma.vmem_to_hbm [thread:$0]  (%p1539_p6), %s1049_s20, 256, %s1051_s0, %s1035_s22  }
 0x4b9 PF: > { %s1062_s15 = sand.u32 1, %s1429_s27   ;;  %p1288_p13 = pnand %p1154_p1, %p1545_p10 }
 0x4ba   : > { %s1063_s13 = scalar_lea.sflag [#allocation5], %s1062_s15 }
 0x4bb   : > { %p1289_p0 = pneg %p1288_p13 }
 0x4bd   : > { %1424 = dma.done.wait (%p1289_p0), %s1063_s13, 256  }
 0x4be   : > { %1426 = vsyncadd (%p1289_p0), %s1063_s13, 4294967040  ;;  %p19_p2 = scmp.ge.s32.totalorder %s1521_s11, 4   ;;  %s1771_s27 = smov %s1433_s28 }
 0x4bf   : > { %s1772_s28 = smov %s1437_s29  ;;  %s1773_s29 = smov %s1533_s14 }
 0x4c0   : > { %s1774_s30 = smov %s1521_s11  ;;  %21 = sbr.rel (!%p19_p2) target bundleno = 8 (0x8), region = 152 }
 0x4c5   :  { %1069 = vsyncpa [#allocation4], 1 }
 0x4c6   :  { %1071 = vsyncpa [#allocation4 + $0x1], 1 }
 0x4c7   :  { %1072 = vsyncpa [#allocation5], 1 }
 0x4c8   :  { %1074 = vsyncpa [#allocation5 + $0x1], 1 }

</bundles_post_ra>
